<compile_context>
chip_gen: v6e
topology: v6e:2x2x1
jax: 0.10.0
libtpu: 0.0.40
codegen_flags: <defaults>
</compile_context>

<pallas_src>
import jax
import jax.numpy as jnp
from jax.experimental import pallas as pl
from jax.experimental.pallas import tpu as pltpu

H1 = 512
H2 = 256
K_IN = 784          # 28 * 28 (unpadded; Mosaic masks the ragged contraction tail)
N_OUT = 10
N_OUT_PAD = 128     # lane-dense output width (padding lanes are zero-weighted)
TB_MAX = 1024       # max batch tile (multiple of 128)


def _round_up(x, m):
    return ((x + m - 1) // m) * m


def _cdiv(a, b):
    return -(-a // b)


def _choose_tiling(B):
    """Pick (TB, B_pad): TB multiple of 128 (16 for tiny B), >=2 grid steps when
    B > 128 (v7x megacore), padding kept below one tile's worth."""
    if B <= 128:
        TB = _round_up(max(B, 1), 16)
        return TB, TB
    num_tiles = max(2, _cdiv(B, TB_MAX))
    TB = min(TB_MAX, _round_up(_cdiv(B, num_tiles), 128))
    B_pad = _round_up(B, TB)
    return TB, B_pad


def fnet_kernel(x_ref, w1_ref, b1_ref, w2_ref, b2_ref, w3_ref, b3_ref, o_ref):
    # fc1 + ReLU   (dropout = identity in eval mode).  Cast x f32 -> bf16 on the
    # fly so the MXU runs at native rate; accumulate in f32.
    x = x_ref[...].astype(jnp.bfloat16)
    h1 = jnp.dot(x, w1_ref[...], preferred_element_type=jnp.float32)
    h1 = jnp.maximum(h1 + b1_ref[...], 0.0)
    # fc2 + ReLU
    h2 = jnp.dot(h1.astype(jnp.bfloat16), w2_ref[...],
                 preferred_element_type=jnp.float32)
    h2 = jnp.maximum(h2 + b2_ref[...], 0.0)
    # out (128 lanes; the 118 extra lanes are zero-weighted).  Store bf16 to halve
    # the (mostly padding) writeback; wrapper casts back to f32.
    o = jnp.dot(h2.astype(jnp.bfloat16), w3_ref[...],
                preferred_element_type=jnp.float32)
    o_ref[...] = (o + b3_ref[...]).astype(o_ref.dtype)


def prepare_params(params):
    """One-time conversion of PyTorch-style (out, in) f32 params to kernel layout.

    Do this once and reuse the result across forward calls (the review's main
    end-to-end win for small/medium batches)."""
    w1, b1, w2, b2, w3, b3 = params
    w1t = jnp.asarray(w1, jnp.float32).T.astype(jnp.bfloat16)            # (784, 512)
    w2t = jnp.asarray(w2, jnp.float32).T.astype(jnp.bfloat16)            # (512, 256)
    w3t = (jnp.zeros((H2, N_OUT_PAD), jnp.float32)
           .at[:, :N_OUT].set(jnp.asarray(w3, jnp.float32).T)
           .astype(jnp.bfloat16))                                        # (256, 128)
    b1r = jnp.asarray(b1, jnp.float32).reshape(1, H1)
    b2r = jnp.asarray(b2, jnp.float32).reshape(1, H2)
    b3p = jnp.zeros((1, N_OUT_PAD), jnp.float32).at[0, :N_OUT].set(
        jnp.asarray(b3, jnp.float32))
    return (w1t, b1r, w2t, b2r, w3t, b3p)


def fnet_forward(x_nchw, prepared_params):
    """x_nchw: (B, 1, 28, 28) float32 -> logits (B, 10) float32."""
    w1t, b1r, w2t, b2r, w3t, b3p = prepared_params

    B = x_nchw.shape[0]
    x2d = x_nchw.reshape(B, K_IN).astype(jnp.float32)

    TB, B_pad = _choose_tiling(B)
    if B_pad != B:
        x2d = jnp.pad(x2d, ((0, B_pad - B), (0, 0)))

    grid = (B_pad // TB,)

    flops = 2 * B_pad * (K_IN * H1 + H1 * H2 + H2 * N_OUT_PAD)
    bytes_accessed = (
        B_pad * K_IN * 4                        # x (f32 in)
        + (w1t.size + w2t.size + w3t.size) * 2  # bf16 weights
        + (b1r.size + b2r.size + b3p.size) * 4  # f32 biases
        + B_pad * N_OUT_PAD * 2                 # bf16 logits out
    )

    out = pl.pallas_call(
        fnet_kernel,
        out_shape=jax.ShapeDtypeStruct((B_pad, N_OUT_PAD), jnp.bfloat16),
        grid=grid,
        in_specs=[
            pl.BlockSpec((TB, K_IN), lambda i: (i, 0)),        # x: tiled over batch
            pl.BlockSpec((K_IN, H1), lambda i: (0, 0)),        # w1: VMEM-resident
            pl.BlockSpec((1, H1), lambda i: (0, 0)),           # b1
            pl.BlockSpec((H1, H2), lambda i: (0, 0)),          # w2
            pl.BlockSpec((1, H2), lambda i: (0, 0)),           # b2
            pl.BlockSpec((H2, N_OUT_PAD), lambda i: (0, 0)),   # w3 (lane-padded)
            pl.BlockSpec((1, N_OUT_PAD), lambda i: (0, 0)),    # b3 (lane-padded)
        ],
        out_specs=pl.BlockSpec((TB, N_OUT_PAD), lambda i: (i, 0)),
        compiler_params=pltpu.CompilerParams(
            dimension_semantics=("parallel",),
            # TB=1024 double-buffered f32 x + f32 temporaries ~17 MiB: above v5e's
            # 16 MiB scoped default, comfortably under physical VMEM everywhere.
            vmem_limit_bytes=32 * 1024 * 1024,
        ),
        cost_estimate=pl.CostEstimate(
            flops=flops, transcendentals=0, bytes_accessed=bytes_accessed),
    )(x2d, w1t, b1r, w2t, b2r, w3t, b3p)

    # Strip batch padding and the lane padding of the logits; back to f32.
    return out[:B, :N_OUT].astype(jnp.float32)


def init_params(key):
    """Deterministic init mimicking nn.Linear's uniform(-1/sqrt(fan_in), 1/sqrt(fan_in))."""
    def linear(k, fan_in, fan_out):
        kw, kb = jax.random.split(k)
        bound = 1.0 / jnp.sqrt(jnp.float32(fan_in))
        w = jax.random.uniform(kw, (fan_out, fan_in), jnp.float32, -bound, bound)
        b = jax.random.uniform(kb, (fan_out,), jnp.float32, -bound, bound)
        return w, b

    k1, k2, k3 = jax.random.split(key, 3)
    w1, b1 = linear(k1, K_IN, H1)
    w2, b2 = linear(k2, H1, H2)
    w3, b3 = linear(k3, H2, N_OUT)
    return (w1, b1, w2, b2, w3, b3)


def fnet_reference(x_nchw, params):
    """Plain-JAX f32 reference matching the PyTorch forward (eval mode)."""
    w1, b1, w2, b2, w3, b3 = params
    x = x_nchw.reshape(x_nchw.shape[0], K_IN)
    x = jnp.maximum(x @ w1.T + b1, 0.0)
    x = jnp.maximum(x @ w2.T + b2, 0.0)
    return x @ w3.T + b3


if __name__ == "__main__":
    key = jax.random.PRNGKey(0)
    kx, kx2, kp = jax.random.split(key, 3)

    params = init_params(kp)
    prepared = prepare_params(params)   # one-time weight prep, reused per call

    # Small batch: single 16-row tile path.
    B = 8
    x = jax.random.normal(kx, (B, 1, 28, 28), jnp.float32)  # NCHW, as PyTorch
    out = jax.block_until_ready(fnet_forward(x, prepared))
    ref = fnet_reference(x, params)
    assert out.shape == (B, N_OUT)
    # Loosened tolerance: bf16 inputs/weights/output with f32 accumulation.
    assert jnp.allclose(out, ref, atol=5e-2, rtol=5e-2), "mismatch vs reference (B=8)"

    # Mid-size batch: exercises >=2 grid steps + batch padding (B=160 -> 2 x 128).
    B2 = 160
    x2 = jax.random.normal(kx2, (B2, 1, 28, 28), jnp.float32)
    out2 = jax.block_until_ready(fnet_forward(x2, prepared))
    ref2 = fnet_reference(x2, params)
    assert out2.shape == (B2, N_OUT)
    assert jnp.allclose(out2, ref2, atol=5e-2, rtol=5e-2), "mismatch vs reference (B=160)"

    print("KERNEL_OK")
</pallas_src>

<mosaic_0001>
module attributes {stable_mosaic.version = 11 : i64} {
  func.func @fnet_kernel(%arg0: i32, %arg1: memref<16x784xf32, #tpu.memory_space<vmem>>, %arg2: memref<784x512xbf16, #tpu.memory_space<vmem>>, %arg3: memref<1x512xf32, #tpu.memory_space<vmem>>, %arg4: memref<512x256xbf16, #tpu.memory_space<vmem>>, %arg5: memref<1x256xf32, #tpu.memory_space<vmem>>, %arg6: memref<256x128xbf16, #tpu.memory_space<vmem>>, %arg7: memref<1x128xf32, #tpu.memory_space<vmem>>, %arg8: memref<16x128xbf16, #tpu.memory_space<vmem>>) attributes {dimension_semantics = [#tpu.dimension_semantics<parallel>], iteration_bounds = array<i64: 1>, scalar_prefetch = 0 : i64, scratch_operands = 0 : i64, tpu.core_type = #tpu.core_type<tc>, window_params = [{transform_indices = @transform_0, window_bounds = array<i64: 16, 784>}, {pipeline_mode = #tpu.pipeline_mode<synchronous>, transform_indices = @transform_1, window_bounds = array<i64: 784, 512>}, {pipeline_mode = #tpu.pipeline_mode<synchronous>, transform_indices = @transform_2, window_bounds = array<i64: 1, 512>}, {pipeline_mode = #tpu.pipeline_mode<synchronous>, transform_indices = @transform_3, window_bounds = array<i64: 512, 256>}, {pipeline_mode = #tpu.pipeline_mode<synchronous>, transform_indices = @transform_4, window_bounds = array<i64: 1, 256>}, {pipeline_mode = #tpu.pipeline_mode<synchronous>, transform_indices = @transform_5, window_bounds = array<i64: 256, 128>}, {pipeline_mode = #tpu.pipeline_mode<synchronous>, transform_indices = @transform_6, window_bounds = array<i64: 1, 128>}, {transform_indices = @transform_7, window_bounds = array<i64: 16, 128>}]} {
    %c0 = arith.constant 0 : index
    %c0_0 = arith.constant 0 : index
    %0 = vector.load %arg1[%c0, %c0_0] : memref<16x784xf32, #tpu.memory_space<vmem>>, vector<16x784xf32>
    %1 = arith.truncf %0 : vector<16x784xf32> to vector<16x784xbf16>
    %c0_1 = arith.constant 0 : index
    %c0_2 = arith.constant 0 : index
    %2 = vector.load %arg2[%c0_1, %c0_2] : memref<784x512xbf16, #tpu.memory_space<vmem>>, vector<784x512xbf16>
    %cst = arith.constant dense<0.000000e+00> : vector<16x512xf32>
    %3 = tpu.matmul %1, %2, %cst {dimension_numbers = #tpu.dot_dimension_numbers<[1], [0], [0], [1], [0, 0, 1, 1], [], []>} : vector<16x784xbf16>, vector<784x512xbf16>, vector<16x512xf32> -> vector<16x512xf32>
    %c0_3 = arith.constant 0 : index
    %c0_4 = arith.constant 0 : index
    %4 = vector.load %arg3[%c0_3, %c0_4] : memref<1x512xf32, #tpu.memory_space<vmem>>, vector<1x512xf32>
    %5 = vector.broadcast %4 : vector<1x512xf32> to vector<16x512xf32>
    %6 = arith.addf %3, %5 : vector<16x512xf32>
    %cst_5 = arith.constant 0.000000e+00 : f32
    %7 = vector.broadcast %cst_5 : f32 to vector<16x512xf32>
    %8 = arith.maximumf %6, %7 : vector<16x512xf32>
    %9 = arith.truncf %8 : vector<16x512xf32> to vector<16x512xbf16>
    %c0_6 = arith.constant 0 : index
    %c0_7 = arith.constant 0 : index
    %10 = vector.load %arg4[%c0_6, %c0_7] : memref<512x256xbf16, #tpu.memory_space<vmem>>, vector<512x256xbf16>
    %cst_8 = arith.constant dense<0.000000e+00> : vector<16x256xf32>
    %11 = tpu.matmul %9, %10, %cst_8 {dimension_numbers = #tpu.dot_dimension_numbers<[1], [0], [0], [1], [0, 0, 1, 1], [], []>} : vector<16x512xbf16>, vector<512x256xbf16>, vector<16x256xf32> -> vector<16x256xf32>
    %c0_9 = arith.constant 0 : index
    %c0_10 = arith.constant 0 : index
    %12 = vector.load %arg5[%c0_9, %c0_10] : memref<1x256xf32, #tpu.memory_space<vmem>>, vector<1x256xf32>
    %13 = vector.broadcast %12 : vector<1x256xf32> to vector<16x256xf32>
    %14 = arith.addf %11, %13 : vector<16x256xf32>
    %cst_11 = arith.constant 0.000000e+00 : f32
    %15 = vector.broadcast %cst_11 : f32 to vector<16x256xf32>
    %16 = arith.maximumf %14, %15 : vector<16x256xf32>
    %17 = arith.truncf %16 : vector<16x256xf32> to vector<16x256xbf16>
    %c0_12 = arith.constant 0 : index
    %c0_13 = arith.constant 0 : index
    %18 = vector.load %arg6[%c0_12, %c0_13] : memref<256x128xbf16, #tpu.memory_space<vmem>>, vector<256x128xbf16>
    %cst_14 = arith.constant dense<0.000000e+00> : vector<16x128xf32>
    %19 = tpu.matmul %17, %18, %cst_14 {dimension_numbers = #tpu.dot_dimension_numbers<[1], [0], [0], [1], [0, 0, 1, 1], [], []>} : vector<16x256xbf16>, vector<256x128xbf16>, vector<16x128xf32> -> vector<16x128xf32>
    %c0_15 = arith.constant 0 : index
    %c0_16 = arith.constant 0 : index
    %20 = vector.load %arg7[%c0_15, %c0_16] : memref<1x128xf32, #tpu.memory_space<vmem>>, vector<1x128xf32>
    %21 = vector.broadcast %20 : vector<1x128xf32> to vector<16x128xf32>
    %22 = arith.addf %19, %21 : vector<16x128xf32>
    %23 = arith.truncf %22 : vector<16x128xf32> to vector<16x128xbf16>
    %c0_17 = arith.constant 0 : index
    %c0_18 = arith.constant 0 : index
    %24 = vector.load %arg8[%c0_17, %c0_18] : memref<16x128xbf16, #tpu.memory_space<vmem>>, vector<16x128xbf16>
    tpu.vector_store %arg8[%c0_17, %c0_18], %23 {strides = array<i32>} : memref<16x128xbf16, #tpu.memory_space<vmem>>, vector<16x128xbf16>,
    return
  }
  func.func @transform_0(%arg0: i32) -> (i32, i32) {
    %c0_i32 = arith.constant 0 : i32
    %c0_i32_0 = arith.constant 0 : i32
    return %arg0, %c0_i32 : i32, i32
  }
  func.func @transform_1(%arg0: i32) -> (i32, i32) {
    %c0_i32 = arith.constant 0 : i32
    %c0_i32_0 = arith.constant 0 : i32
    %c0_i32_1 = arith.constant 0 : i32
    return %c0_i32, %c0_i32_0 : i32, i32
  }
  func.func @transform_2(%arg0: i32) -> (i32, i32) {
    %c0_i32 = arith.constant 0 : i32
    %c0_i32_0 = arith.constant 0 : i32
    %c0_i32_1 = arith.constant 0 : i32
    return %c0_i32, %c0_i32_0 : i32, i32
  }
  func.func @transform_3(%arg0: i32) -> (i32, i32) {
    %c0_i32 = arith.constant 0 : i32
    %c0_i32_0 = arith.constant 0 : i32
    %c0_i32_1 = arith.constant 0 : i32
    return %c0_i32, %c0_i32_0 : i32, i32
  }
  func.func @transform_4(%arg0: i32) -> (i32, i32) {
    %c0_i32 = arith.constant 0 : i32
    %c0_i32_0 = arith.constant 0 : i32
    %c0_i32_1 = arith.constant 0 : i32
    return %c0_i32, %c0_i32_0 : i32, i32
  }
  func.func @transform_5(%arg0: i32) -> (i32, i32) {
    %c0_i32 = arith.constant 0 : i32
    %c0_i32_0 = arith.constant 0 : i32
    %c0_i32_1 = arith.constant 0 : i32
    return %c0_i32, %c0_i32_0 : i32, i32
  }
  func.func @transform_6(%arg0: i32) -> (i32, i32) {
    %c0_i32 = arith.constant 0 : i32
    %c0_i32_0 = arith.constant 0 : i32
    %c0_i32_1 = arith.constant 0 : i32
    return %c0_i32, %c0_i32_0 : i32, i32
  }
  func.func @transform_7(%arg0: i32) -> (i32, i32) {
    %c0_i32 = arith.constant 0 : i32
    %c0_i32_0 = arith.constant 0 : i32
    return %arg0, %c0_i32 : i32, i32
  }
}

</mosaic_0001>

<bundles_post_ra>
// kernel: tpu_custom_call.1
= control target key start
LH: loop header
LB: loop body
LE: loop exit
PB: predicated region body
PF: predicated region fallthrough
CT: control target
= control target key end

     0   :  { %12 = vsyncpa [#allocation3], 0  ;;  %s3356_s0 = inlined_call_operand.hbm [shape: f32[16,784], index: 0, kind: input, shape index: {}]   ;;  %s3357_s1 = inlined_call_operand.hbm [shape: bf16[784,512], index: 1, kind: input, shape index: {}]   ;;  %s3358_s2 = inlined_call_operand.hbm [shape: f32[1,512], index: 2, kind: input, shape index: {}]   ;;  %s3359_s3 = inlined_call_operand.hbm [shape: bf16[512,256], index: 3, kind: input, shape index: {}]   ;;  %s3360_s4 = inlined_call_operand.vmem [shape: f32[1,256], index: 4, kind: input, shape index: {}]   ;;  %s3361_s5 = inlined_call_operand.hbm [shape: bf16[256,128], index: 5, kind: input, shape index: {}]   ;;  %s3362_s6 = inlined_call_operand.vmem [shape: f32[1,128], index: 6, kind: input, shape index: {}]   ;;  %s3363_s7 = inlined_call_operand.hbm [shape: bf16[16,128], index: 7, kind: output, shape index: {}]  }
   0x1   :  { %13 = vsyncpa [#allocation6], 0 }
   0x2   :  { %14 = vsyncpa [#allocation9], 0 }
   0x3   :  { %15 = vsyncpa [#allocation4], 0  ;;  %s3225_s24 = smov [#allocation5]  }
   0x4   :  { %s33_s25 = sshll.u32 %s3225_s24, 4  ;;  %s34_s25 = int_to_ptr.vmem [resolvable:$true] %s33_s25 }
   0x5   :  { %s3105_s26 = scalar_lea.vmem %s34_s25, 25088  ;;  %p3110_p1 = scmp.lt.s32.totalorder %s34_s25, %s34_s25 }
   0x6   :  { %p3106_p0 = scmp.ne.s32.totalorder %s34_s25, %s3105_s26  ;;  %p3111_p2 = scmp.lt.s32.totalorder %s3105_s26, %s3105_s26 }
   0x8   :  { %p3112_p3 = por %p3111_p2, %p3110_p1 }
   0xa   :  { %p3113_p4 = pnand %p3112_p3, %p3106_p0 }
   0xc   :  { %3116 = shalt.err (!%p3113_p4)
}
   0xd   :  { %s3226_s27 = smov 256   ;;  %s3227_s28 = smov 16  }
   0xe   :  { %39 = dma.hbm_to_vmem [thread:$0]  %s3357_s1, 25088, %s34_s25, [#allocation6], %s3226_s27, %s3226_s27, %s3227_s28  }
   0xf   :  { %s3228_s8 = smov [#allocation8]  }
  0x10   :  { %s55_s9 = sshll.u32 %s3228_s8, 4  ;;  %s56_s9 = int_to_ptr.vmem [resolvable:$true] %s55_s9 }
  0x11   :  { %s3125_s10 = scalar_lea.vmem %s56_s9, 8192  ;;  %p3130_p6 = scmp.lt.s32.totalorder %s56_s9, %s56_s9 }
  0x12   :  { %p3126_p5 = scmp.ne.s32.totalorder %s56_s9, %s3125_s10  ;;  %p3131_p7 = scmp.lt.s32.totalorder %s3125_s10, %s3125_s10 }
  0x14   :  { %p3132_p8 = por %p3131_p7, %p3130_p6 }
  0x16   :  { %p3133_p9 = pnand %p3132_p8, %p3126_p5 }
  0x18   :  { %3136 = shalt.err (!%p3133_p9)
}
  0x19   :  { %s3229_s11 = smov 128   ;;  %s3230_s12 = smov 8  }
  0x1a   :  { %61 = dma.hbm_to_vmem [thread:$0]  %s3359_s3, 8192, %s56_s9, [#allocation9], %s3229_s11, %s3229_s11, %s3230_s12  }
  0x1b   :  { %s3231_s15 = smov [#allocation2]  }
  0x1c   :  { %s21_s16 = sshll.u32 %s3231_s15, 4  ;;  %s22_s16 = int_to_ptr.vmem [resolvable:$true] %s21_s16 }
  0x1d   :  { %s3145_s1 = scalar_lea.vmem %s22_s16, 1792  ;;  %p3150_p11 = scmp.lt.s32.totalorder %s22_s16, %s22_s16 }
  0x1e   :  { %p3146_p10 = scmp.ne.s32.totalorder %s22_s16, %s3145_s1  ;;  %p3151_p12 = scmp.lt.s32.totalorder %s3145_s1, %s3145_s1 }
  0x20   :  { %p3152_p13 = por %p3151_p12, %p3150_p11 }
  0x22   :  { %p3153_p0 = pnand %p3152_p13, %p3146_p10 }
  0x24   :  { %3156 = shalt.err (!%p3153_p0)
}
  0x25   :  { %s3232_s17 = smov 896   ;;  %s3233_s18 = smov 56  }
  0x26   :  { %27 = dma.hbm_to_vmem [thread:$0]  %s3356_s0, 1792, %s22_s16, [#allocation3], %s3232_s17, %s3232_s17, %s3233_s18  }
  0x27   :  { %s3234_s21 = smov [#allocation7]   ;;  %s3235_s3 = smov [#allocation10]  }
  0x28   :  { %s46_s22 = sshll.u32 %s3234_s21, 4  ;;  %s69_s23 = sshll.u32 %s3235_s3, 4  ;;  %s47_s22 = int_to_ptr.vmem [resolvable:$true] %s46_s22  ;;  %s70_s23 = int_to_ptr.vmem [resolvable:$true] %s69_s23 }
  0x29   :  { %s3165_s24 = scalar_lea.vmem %s47_s22, 64  ;;  %p3170_p2 = scmp.lt.s32.totalorder %s47_s22, %s47_s22 }
  0x2a   :  { %p3166_p1 = scmp.ne.s32.totalorder %s47_s22, %s3165_s24  ;;  %p3171_p3 = scmp.lt.s32.totalorder %s3165_s24, %s3165_s24 }
  0x2c   :  { %p3172_p4 = por %p3171_p3, %p3170_p2 }
  0x2e   :  { %p3173_p5 = pnand %p3172_p4, %p3166_p1 }
  0x30   :  { %3176 = shalt.err (!%p3173_p5)
}
  0x31   :  { %49 = dma.hbm_to_vmem [thread:$0]  %s3358_s2, 64, %s47_s22, [#allocation6]  }
  0x32   :  { %s3185_s27 = scalar_lea.vmem %s70_s23, 2048  ;;  %p3190_p7 = scmp.lt.s32.totalorder %s70_s23, %s70_s23 }
  0x33   :  { %p3186_p6 = scmp.ne.s32.totalorder %s70_s23, %s3185_s27  ;;  %p3191_p8 = scmp.lt.s32.totalorder %s3185_s27, %s3185_s27 }
  0x35   :  { %p3192_p9 = por %p3191_p8, %p3190_p7 }
  0x37   :  { %p3193_p10 = pnand %p3192_p9, %p3186_p6 }
  0x39   :  { %3196 = shalt.err (!%p3193_p10)
}
  0x3a   :  { %s3236_s0 = smov 64   ;;  %s3237_s28 = smov 4  }
  0x3b   :  { %75 = dma.hbm_to_vmem [thread:$0]  %s3361_s5, 2048, %s70_s23, [#allocation9], %s3236_s0, %s3236_s0, %s3237_s28  }
  0x3c   :  { %3217 = dma.done.wait [#allocation3], 1792  }
  0x3d   :  { %3218 = vsyncadd [#allocation3], 4294965504 }
  0x3e   :  { %3219 = dma.done.wait [#allocation6], 25152  }
  0x3f   :  { %3220 = vsyncadd [#allocation6], 4294942144 }
  0x40   :  { %3221 = dma.done.wait [#allocation9], 10240  }
  0x41   :  { %3222 = vsyncadd [#allocation9], 4294957056  ;;  %v2691_v0 = vld [vmem:[#allocation5 + $0xe4] ss:$16 sps:$4 sm:$0xff]   ;;  %v2695_v2 = vld [vmem:[#allocation5 + $0xe0] ss:$16 sps:$4 sm:$0xff]  }
  0x42   :  { %v2693_v1 = vld [vmem:[#allocation5 + $0x2e4] ss:$16 sps:$4 sm:$0xff]   ;;  %1317 = vmatprep.subr.bf16.mxu0 %v2691_v0  ;;  %v2696_v3 = vld [vmem:[#allocation5 + $0x2e0] ss:$16 sps:$4 sm:$0xff]   ;;  %v95_v46 = vld [vmem:[#allocation2 + $0x8] sm:$0xff]  ;;  %vm1313_vm0 = vcmask 130048  }
  0x43   :  { %1360 = vmatprep.subr.bf16.mxu1 %v2693_v1  ;;  %v2697_v4 = vld [vmem:[#allocation5 + $0xc4] ss:$16 sps:$4 sm:$0xff]   ;;  %1318 = vmatpush1.bf16.msra.mxu0 %v2695_v2  ;;  %v2701_v6 = vld [vmem:[#allocation5 + $0xc0] ss:$16 sps:$4 sm:$0xff]   ;;  %v97_v48 = vld [vmem:[#allocation2 + $0x18] sm:$0xff]  ;;  %s3239_s9 = smov [#allocation11]  }
  0x44   :  { %1361 = vmatpush1.bf16.msra.mxu1 %v2696_v3  ;;  %v2699_v5 = vld [vmem:[#allocation5 + $0x2c4] ss:$16 sps:$4 sm:$0xff]   ;;  %1319 = vmatprep.subr.bf16.mxu0 %v2697_v4  ;;  %v2702_v7 = vld [vmem:[#allocation5 + $0x2c0] ss:$16 sps:$4 sm:$0xff]   ;;  %s2352_s10 = sshll.u32 %s3239_s9, 4  ;;  %s2353_s10 = int_to_ptr.vmem [resolvable:$true] %s2352_s10 }
  0x45   :  { %1362 = vmatprep.subr.bf16.mxu1 %v2699_v5  ;;  %v2703_v8 = vld [vmem:[#allocation5 + $0xa4] ss:$16 sps:$4 sm:$0xff]   ;;  %v2707_v10 = vld [vmem:[#allocation5 + $0xa0] ss:$16 sps:$4 sm:$0xff]   ;;  %s3197_s11 = scalar_lea.vmem %s2353_s10, 128  ;;  %p3202_p12 = scmp.lt.s32.totalorder %s2353_s10, %s2353_s10 }
  0x46   :  { %v2705_v9 = vld [vmem:[#allocation5 + $0x2a4] ss:$16 sps:$4 sm:$0xff]   ;;  %v2708_v11 = vld [vmem:[#allocation5 + $0x2a0] ss:$16 sps:$4 sm:$0xff]   ;;  %p3198_p11 = scmp.ne.s32.totalorder %s2353_s10, %s3197_s11  ;;  %p3203_p13 = scmp.lt.s32.totalorder %s3197_s11, %s3197_s11 }
  0x47   :  { %1320 = vmatpush1.bf16.msra.mxu0 %v2701_v6  ;;  %v2709_v12 = vld [vmem:[#allocation5 + $0x84] ss:$16 sps:$4 sm:$0xff]   ;;  %v2713_v14 = vld [vmem:[#allocation5 + $0x80] ss:$16 sps:$4 sm:$0xff]  }
  0x48   :  { %1363 = vmatpush1.bf16.msra.mxu1 %v2702_v7  ;;  %1321 = vmatprep.subr.bf16.mxu0 %v2703_v8  ;;  %v2711_v13 = vld [vmem:[#allocation5 + $0x284] ss:$16 sps:$4 sm:$0xff]   ;;  %v2714_v15 = vld [vmem:[#allocation5 + $0x280] ss:$16 sps:$4 sm:$0xff]   ;;  %v101_v7 = vld [vmem:[#allocation2 + $0x38] sm:$0xff]  ;;  %p3204_p0 = por %p3203_p13, %p3202_p12 }
  0x49   :  { %1364 = vmatprep.subr.bf16.mxu1 %v2705_v9  ;;  %v2715_v16 = vld [vmem:[#allocation5 + $0x64] ss:$16 sps:$4 sm:$0xff]   ;;  %v2719_v18 = vld [vmem:[#allocation5 + $0x60] ss:$16 sps:$4 sm:$0xff]   ;;  %v103_v9 = vld [vmem:[#allocation2 + $0x48] sm:$0xff] }
  0x4a   :  { %v2717_v17 = vld [vmem:[#allocation5 + $0x264] ss:$16 sps:$4 sm:$0xff]   ;;  %v2720_v19 = vld [vmem:[#allocation5 + $0x260] ss:$16 sps:$4 sm:$0xff]   ;;  %p3205_p1 = pnand %p3204_p0, %p3198_p11 }
  0x4b   :  { %1322 = vmatpush1.bf16.msra.mxu0 %v2707_v10  ;;  %v2721_v20 = vld [vmem:[#allocation5 + $0x44] ss:$16 sps:$4 sm:$0xff]   ;;  %v2725_v22 = vld [vmem:[#allocation5 + $0x40] ss:$16 sps:$4 sm:$0xff]  }
  0x4c   :  { %1365 = vmatpush1.bf16.msra.mxu1 %v2708_v11  ;;  %1323 = vmatprep.subr.bf16.mxu0 %v2709_v12  ;;  %v2723_v21 = vld [vmem:[#allocation5 + $0x244] ss:$16 sps:$4 sm:$0xff]   ;;  %v2726_v23 = vld [vmem:[#allocation5 + $0x240] ss:$16 sps:$4 sm:$0xff]  }
  0x4d   :  { %1366 = vmatprep.subr.bf16.mxu1 %v2711_v13  ;;  %v2727_v24 = vld [vmem:[#allocation5 + $0x24] ss:$16 sps:$4 sm:$0xff]   ;;  %v2731_v26 = vld [vmem:[#allocation5 + $0x20] ss:$16 sps:$4 sm:$0xff]  }
  0x4e   :  { %v2729_v25 = vld [vmem:[#allocation5 + $0x224] ss:$16 sps:$4 sm:$0xff]   ;;  %v2732_v27 = vld [vmem:[#allocation5 + $0x220] ss:$16 sps:$4 sm:$0xff]  }
  0x4f   :  { %1324 = vmatpush1.bf16.msra.mxu0 %v2713_v14  ;;  %v2733_v28 = vld [vmem:[#allocation5 + $0x4] ss:$16 sps:$4 sm:$0xff]   ;;  %v2737_v30 = vld [vmem:[#allocation5] ss:$16 sps:$4 sm:$0xff]  }
  0x50   :  { %1367 = vmatpush1.bf16.msra.mxu1 %v2714_v15  ;;  %1325 = vmatprep.subr.bf16.mxu0 %v2715_v16  ;;  %v2735_v29 = vld [vmem:[#allocation5 + $0x204] ss:$16 sps:$4 sm:$0xff]   ;;  %v2738_v31 = vld [vmem:[#allocation5 + $0x200] ss:$16 sps:$4 sm:$0xff]  }
  0x51   :  { %1368 = vmatprep.subr.bf16.mxu1 %v2717_v17  ;;  %v2739_v32 = vld [vmem:[#allocation5 + $0x1e4] ss:$16 sps:$4 sm:$0xff]   ;;  %v2743_v34 = vld [vmem:[#allocation5 + $0x1e0] ss:$16 sps:$4 sm:$0xff]   ;;  %v2798_v17 = vld [vmem:[#allocation5 + $0xec] ss:$16 sps:$4 sm:$0xff]  }
  0x52   :  { %v2741_v33 = vld [vmem:[#allocation5 + $0x3e4] ss:$16 sps:$4 sm:$0xff]   ;;  %v2744_v35 = vld [vmem:[#allocation5 + $0x3e0] ss:$16 sps:$4 sm:$0xff]  }
  0x53   :  { %1326 = vmatpush1.bf16.msra.mxu0 %v2719_v18  ;;  %v2745_v36 = vld [vmem:[#allocation5 + $0x1c4] ss:$16 sps:$4 sm:$0xff]   ;;  %v2749_v38 = vld [vmem:[#allocation5 + $0x1c0] ss:$16 sps:$4 sm:$0xff]  }
  0x54   :  { %1369 = vmatpush1.bf16.msra.mxu1 %v2720_v19  ;;  %1327 = vmatprep.subr.bf16.mxu0 %v2721_v20  ;;  %v2747_v37 = vld [vmem:[#allocation5 + $0x3c4] ss:$16 sps:$4 sm:$0xff]   ;;  %v2750_v39 = vld [vmem:[#allocation5 + $0x3c0] ss:$16 sps:$4 sm:$0xff]   ;;  %v107_v20 = vld [vmem:[#allocation2 + $0x68] sm:$0xff] }
  0x55   :  { %1370 = vmatprep.subr.bf16.mxu1 %v2723_v21  ;;  %v2751_v40 = vld [vmem:[#allocation5 + $0x1a4] ss:$16 sps:$4 sm:$0xff]   ;;  %v2755_v42 = vld [vmem:[#allocation5 + $0x1a0] ss:$16 sps:$4 sm:$0xff]   ;;  %v3238_v21 = vmov 0  }
  0x56   :  { %v2753_v41 = vld [vmem:[#allocation5 + $0x3a4] ss:$16 sps:$4 sm:$0xff]   ;;  %v2756_v43 = vld [vmem:[#allocation5 + $0x3a0] ss:$16 sps:$4 sm:$0xff]  }
  0x57   :  { %1328 = vmatpush1.bf16.msra.mxu0 %v2725_v22  ;;  %v2757_v44 = vld [vmem:[#allocation5 + $0x184] ss:$16 sps:$4 sm:$0xff]   ;;  %v2761_v50 = vld [vmem:[#allocation5 + $0x180] ss:$16 sps:$4 sm:$0xff]  }
  0x58   :  { %1371 = vmatpush1.bf16.msra.mxu1 %v2726_v23  ;;  %1329 = vmatprep.subr.bf16.mxu0 %v2727_v24  ;;  %v2759_v45 = vld [vmem:[#allocation5 + $0x384] ss:$16 sps:$4 sm:$0xff]   ;;  %v2762_v51 = vld [vmem:[#allocation5 + $0x380] ss:$16 sps:$4 sm:$0xff]   ;;  %v2796_v24 = vld [vmem:[#allocation5 + $0xe8] ss:$16 sps:$4 sm:$0xff]  }
  0x59   :  { %1372 = vmatprep.subr.bf16.mxu1 %v2729_v25  ;;  %v102_v47 = vld [vmem:[#allocation2 + $0x40] sm:$0xff]  ;;  %v104_v49 = vld [vmem:[#allocation2 + $0x50] sm:$0xff] }
  0x5a   :  { %v2763_v52 = vld [vmem:[#allocation5 + $0x164] ss:$16 sps:$4 sm:$0xff]   ;;  %v3298_v53 = vpack.c.bf16 %v102_v47, %v95_v46  ;;  %v3300_v54 = vpack.c.bf16 %v104_v49, %v97_v48  ;;  %v2767_v56 = vld [vmem:[#allocation5 + $0x160] ss:$16 sps:$4 sm:$0xff]   ;;  %v2826_v47 = vld [vmem:[#allocation5 + $0x48] ss:$16 sps:$4 sm:$0xff]  }
  0x5b   :  { %1330 = vmatpush1.bf16.msra.mxu0 %v2731_v26  ;;  %v2765_v55 = vld [vmem:[#allocation5 + $0x364] ss:$16 sps:$4 sm:$0xff]   ;;  %v2768_v57 = vld [vmem:[#allocation5 + $0x360] ss:$16 sps:$4 sm:$0xff]   ;;  %v2804_v26 = vld [vmem:[#allocation5 + $0xcc] ss:$16 sps:$4 sm:$0xff]  }
  0x5c   :  { %1373 = vmatpush1.bf16.msra.mxu1 %v2732_v27  ;;  %1331 = vmatprep.subr.bf16.mxu0 %v2733_v28  ;;  %v2769_v58 = vld [vmem:[#allocation5 + $0x144] ss:$16 sps:$4 sm:$0xff]   ;;  %v2773_v60 = vld [vmem:[#allocation5 + $0x140] ss:$16 sps:$4 sm:$0xff]   ;;  %v2802_v28 = vld [vmem:[#allocation5 + $0xc8] ss:$16 sps:$4 sm:$0xff]  }
  0x5d   :  { %1374 = vmatprep.subr.bf16.mxu1 %v2735_v29  ;;  %1349 = vmatprep.mubr.bf16.mxu0 %v3298_v53  ;;  %v2771_v59 = vld [vmem:[#allocation5 + $0x344] ss:$16 sps:$4 sm:$0xff]   ;;  %v2774_v61 = vld [vmem:[#allocation5 + $0x340] ss:$16 sps:$4 sm:$0xff]   ;;  %v2834_v49 = vld [vmem:[#allocation5 + $0x2c] ss:$16 sps:$4 sm:$0xff]  }
  0x5e   :  { %1392 = vmatprep.mubr.bf16.mxu1 %v3300_v54  ;;  %v2775_v62 = vld [vmem:[#allocation5 + $0x124] ss:$16 sps:$4 sm:$0xff]   ;;  %v2779_v0 = vld [vmem:[#allocation5 + $0x120] ss:$16 sps:$4 sm:$0xff]  }
  0x5f   :  { %1332 = vmatpush1.bf16.msra.mxu0 %v2737_v30  ;;  %v2777_v63 = vld [vmem:[#allocation5 + $0x324] ss:$16 sps:$4 sm:$0xff]   ;;  %v2780_v1 = vld [vmem:[#allocation5 + $0x320] ss:$16 sps:$4 sm:$0xff]   ;;  %v2810_v30 = vld [vmem:[#allocation5 + $0xac] ss:$16 sps:$4 sm:$0xff]  }
  0x60   :  { %1375 = vmatpush1.bf16.msra.mxu1 %v2738_v31  ;;  %1333 = vmatprep.subr.bf16.mxu0 %v2739_v32  ;;  %v2781_v2 = vld [vmem:[#allocation5 + $0x104] ss:$16 sps:$4 sm:$0xff]   ;;  %v2785_v4 = vld [vmem:[#allocation5 + $0x100] ss:$16 sps:$4 sm:$0xff]   ;;  %v2808_v32 = vld [vmem:[#allocation5 + $0xa8] ss:$16 sps:$4 sm:$0xff]  }
  0x61   :  { %1376 = vmatprep.subr.bf16.mxu1 %v2741_v33  ;;  %v2783_v3 = vld [vmem:[#allocation5 + $0x304] ss:$16 sps:$4 sm:$0xff]   ;;  %v2786_v5 = vld [vmem:[#allocation5 + $0x300] ss:$16 sps:$4 sm:$0xff]  }
  0x62   :  { %v94_v6 = vld [vmem:[#allocation2] sm:$0xff]  ;;  %v96_v8 = vld [vmem:[#allocation2 + $0x10] sm:$0xff] }
  0x63   :  { %1334 = vmatpush2.bf16.msra.mxu0 %v2743_v34  ;;  %v2789_v10 = vld [vmem:[#allocation5 + $0x4e4] ss:$16 sps:$4 sm:$0xff]   ;;  %v3304_v12 = vpack.c.bf16 %v101_v7, %v94_v6  ;;  %v3306_v13 = vpack.c.bf16 %v103_v9, %v96_v8  ;;  %v2787_v14 = vld [vmem:[#allocation5 + $0x4e0] ss:$16 sps:$4 sm:$0xff]   ;;  %v2816_v34 = vld [vmem:[#allocation5 + $0x8c] ss:$16 sps:$4 sm:$0xff]  }
  0x64   :  { %1377 = vmatpush2.bf16.msra.mxu1 %v2744_v35  ;;  %1335 = vmatprep.subr.bf16.mxu0 %v2745_v36  ;;  %v2792_v11 = vld [vmem:[#allocation5 + $0x604] ss:$16 sps:$4 sm:$0xff]   ;;  %v2790_v15 = vld [vmem:[#allocation5 + $0x600] ss:$16 sps:$4 sm:$0xff]   ;;  %v2814_v36 = vld [vmem:[#allocation5 + $0x88] ss:$16 sps:$4 sm:$0xff]  }
  0x65   :  { %1378 = vmatprep.subr.bf16.mxu1 %v2747_v37  ;;  %v2795_v16 = vld [vmem:[#allocation5 + $0x4c4] ss:$16 sps:$4 sm:$0xff]   ;;  %v2793_v18 = vld [vmem:[#allocation5 + $0x4c0] ss:$16 sps:$4 sm:$0xff]   ;;  %v2864_v6 = vld [vmem:[#allocation5 + $0x18c] ss:$16 sps:$4 sm:$0xff]  }
  0x66   :  { %v100_v19 = vld [vmem:[#allocation2 + $0x30] sm:$0xff]  ;;  %v2862_v8 = vld [vmem:[#allocation5 + $0x188] ss:$16 sps:$4 sm:$0xff]  }
  0x67   :  { %1336 = vmatpush2.bf16.msra.mxu0 %v2749_v38  ;;  %v2801_v22 = vld [vmem:[#allocation5 + $0x4a4] ss:$16 sps:$4 sm:$0xff]   ;;  %v3311_v23 = vpack.c.bf16 %v107_v20, %v100_v19  ;;  %v2799_v25 = vld [vmem:[#allocation5 + $0x4a0] ss:$16 sps:$4 sm:$0xff]   ;;  %v2822_v38 = vld [vmem:[#allocation5 + $0x6c] ss:$16 sps:$4 sm:$0xff]  }
  0x68   :  { %1379 = vmatpush2.bf16.msra.mxu1 %v2750_v39  ;;  %1337 = vmatprep.subr.bf16.mxu0 %v2751_v40  ;;  %v2807_v27 = vld [vmem:[#allocation5 + $0x484] ss:$16 sps:$4 sm:$0xff]   ;;  %v2805_v29 = vld [vmem:[#allocation5 + $0x480] ss:$16 sps:$4 sm:$0xff]   ;;  %v2820_v40 = vld [vmem:[#allocation5 + $0x68] ss:$16 sps:$4 sm:$0xff]  }
  0x69   :  { %1380 = vmatprep.subr.bf16.mxu1 %v2753_v41  ;;  %v2813_v31 = vld [vmem:[#allocation5 + $0x464] ss:$16 sps:$4 sm:$0xff]   ;;  %v2811_v33 = vld [vmem:[#allocation5 + $0x460] ss:$16 sps:$4 sm:$0xff]   ;;  %v99_v41 = vld [vmem:[#allocation2 + $0x28] sm:$0xff] }
  0x6a   :  { %v2819_v35 = vld [vmem:[#allocation5 + $0x444] ss:$16 sps:$4 sm:$0xff]   ;;  %v2817_v37 = vld [vmem:[#allocation5 + $0x440] ss:$16 sps:$4 sm:$0xff]  }
  0x6b   :  { %1338 = vmatpush2.bf16.msra.mxu0 %v2755_v42  ;;  %v2825_v39 = vld [vmem:[#allocation5 + $0x424] ss:$16 sps:$4 sm:$0xff]   ;;  %v2829_v48 = vld [vmem:[#allocation5 + $0x400] ss:$16 sps:$4 sm:$0xff]  }
  0x6c   :  { %1381 = vmatpush2.bf16.msra.mxu1 %v2756_v43  ;;  %1339 = vmatprep.subr.bf16.mxu0 %v2757_v44  ;;  %v106_v42 = vld [vmem:[#allocation2 + $0x60] sm:$0xff] }
  0x6d   :  { %1382 = vmatprep.subr.bf16.mxu1 %v2759_v45  ;;  %v2823_v43 = vld [vmem:[#allocation5 + $0x420] ss:$16 sps:$4 sm:$0xff]   ;;  %v3316_v44 = vpack.c.bf16 %v106_v42, %v99_v41  ;;  %v2828_v45 = vld [vmem:[#allocation5 + $0x4c] ss:$16 sps:$4 sm:$0xff]   ;;  %v2831_v46 = vld [vmem:[#allocation5 + $0x404] ss:$16 sps:$4 sm:$0xff]  }
  0x6e   :  { %v2867_v7 = vld [vmem:[#allocation5 + $0x544] ss:$16 sps:$4 sm:$0xff]   ;;  %v2865_v9 = vld [vmem:[#allocation5 + $0x540] ss:$16 sps:$4 sm:$0xff]   ;;  %v2906_v41 = vld [vmem:[#allocation5 + $0x4ac] ss:$16 sps:$4 sm:$0xff]  }
  0x6f   :  { %1340 = vmatpush2.bf16.msra.mxu0 %v2761_v50  ;;  %v2837_v50 = vld [vmem:[#allocation5 + $0x5e4] ss:$16 sps:$4 sm:$0xff]   ;;  %v2877_v19 = vld [vmem:[#allocation5 + $0x500] ss:$16 sps:$4 sm:$0xff]   ;;  %v2909_v42 = vld [vmem:[#allocation5 + $0x26c] ss:$16 sps:$4 sm:$0xff]  }
  0x70   :  { %1383 = vmatpush2.bf16.msra.mxu1 %v2762_v51  ;;  %1341 = vmatprep.subr.bf16.mxu0 %v2763_v52  ;;  %v2832_v51 = vld [vmem:[#allocation5 + $0x28] ss:$16 sps:$4 sm:$0xff]   ;;  %v2835_v52 = vld [vmem:[#allocation5 + $0x5e0] ss:$16 sps:$4 sm:$0xff]  }
  0x71   :  { %1384 = vmatprep.subr.bf16.mxu1 %v2765_v55  ;;  %v2843_v55 = vld [vmem:[#allocation5 + $0x5c4] ss:$16 sps:$4 sm:$0xff]  }
  0x72   :  { %v98_v20 = vld [vmem:[#allocation2 + $0x20] sm:$0xff] }
  0x73   :  { %1342 = vmatpush2.bf16.msra.mxu0 %v2767_v56  ;;  %v2838_v56 = vld [vmem:[#allocation5 + $0x8] ss:$16 sps:$4 sm:$0xff]  }
  0x74   :  { %1385 = vmatpush2.bf16.msra.mxu1 %v2768_v57  ;;  %1343 = vmatprep.subr.bf16.mxu0 %v2769_v58  ;;  %v2841_v57 = vld [vmem:[#allocation5 + $0x5c0] ss:$16 sps:$4 sm:$0xff]   ;;  %v2846_v58 = vld [vmem:[#allocation5 + $0x1ec] ss:$16 sps:$4 sm:$0xff]  }
  0x75   :  { %1386 = vmatprep.subr.bf16.mxu1 %v2771_v59  ;;  %v2849_v59 = vld [vmem:[#allocation5 + $0x5a4] ss:$16 sps:$4 sm:$0xff]  }
  0x77   :  { %1344 = vmatpush2.bf16.msra.mxu0 %v2773_v60  ;;  %v2844_v60 = vld [vmem:[#allocation5 + $0x1e8] ss:$16 sps:$4 sm:$0xff]  }
  0x78   :  { %1387 = vmatpush2.bf16.msra.mxu1 %v2774_v61  ;;  %1345 = vmatprep.subr.bf16.mxu0 %v2775_v62  ;;  %v2847_v61 = vld [vmem:[#allocation5 + $0x5a0] ss:$16 sps:$4 sm:$0xff]   ;;  %v2852_v62 = vld [vmem:[#allocation5 + $0x1cc] ss:$16 sps:$4 sm:$0xff]  }
  0x79   :  { %1388 = vmatprep.subr.bf16.mxu1 %v2777_v63  ;;  %v2855_v63 = vld [vmem:[#allocation5 + $0x584] ss:$16 sps:$4 sm:$0xff]  }
  0x7b   :  { %1346 = vmatpush2.bf16.msra.mxu0 %v2779_v0  ;;  %v2850_v0 = vld [vmem:[#allocation5 + $0x1c8] ss:$16 sps:$4 sm:$0xff]  }
  0x7c   :  { %1389 = vmatpush2.bf16.msra.mxu1 %v2780_v1  ;;  %1347 = vmatprep.subr.bf16.mxu0 %v2781_v2  ;;  %v2853_v1 = vld [vmem:[#allocation5 + $0x580] ss:$16 sps:$4 sm:$0xff]   ;;  %v2858_v2 = vld [vmem:[#allocation5 + $0x1ac] ss:$16 sps:$4 sm:$0xff]  }
  0x7d   :  { %1390 = vmatprep.subr.bf16.mxu1 %v2783_v3  ;;  %v2861_v3 = vld [vmem:[#allocation5 + $0x564] ss:$16 sps:$4 sm:$0xff]  }
  0x7f   :  { %1348 = vmatpush2.bf16.msra.mxu0 %v2785_v4  ;;  %v2856_v4 = vld [vmem:[#allocation5 + $0x1a8] ss:$16 sps:$4 sm:$0xff]  }
  0x80   :  { %1391 = vmatpush2.bf16.msra.mxu1 %v2786_v5  ;;  %1403 = vmatprep.subr.bf16.mxu0 %v2789_v10  ;;  %v2859_v5 = vld [vmem:[#allocation5 + $0x560] ss:$16 sps:$4 sm:$0xff]   ;;  %v2870_v10 = vld [vmem:[#allocation5 + $0x16c] ss:$16 sps:$4 sm:$0xff]  }
  0x81   :  { %1460 = vmatprep.subr.bf16.mxu1 %v2792_v11  ;;  %v2873_v11 = vld [vmem:[#allocation5 + $0x524] ss:$16 sps:$4 sm:$0xff]  }
  0x82   :  { %1350 = vmatmul.mubr.bf16.vlgmr.msra.gmra.mxu0 %v3304_v12 }
  0x83   :  { %1393 = vmatmul.mubr.bf16.vlgmr.msra.gmra.mxu1 %v3306_v13  ;;  %1404 = vmatpush1.bf16.msra.mxu0 %v2787_v14  ;;  %v2868_v14 = vld [vmem:[#allocation5 + $0x168] ss:$16 sps:$4 sm:$0xff]  }
  0x84   :  { %1461 = vmatpush1.bf16.msra.mxu1 %v2790_v15  ;;  %1405 = vmatprep.subr.bf16.mxu0 %v2795_v16  ;;  %v2871_v15 = vld [vmem:[#allocation5 + $0x520] ss:$16 sps:$4 sm:$0xff]   ;;  %v2876_v16 = vld [vmem:[#allocation5 + $0x14c] ss:$16 sps:$4 sm:$0xff]  }
  0x85   :  { %1478 = vmatprep.mubr.bf16.mxu1 %v3238_v21  ;;  %1489 = vmatprep.subr.bf16.mxu1 %v2798_v17  ;;  %v2879_v17 = vld [vmem:[#allocation5 + $0x504] ss:$16 sps:$4 sm:$0xff]  }
  0x86   :  { %1435 = vmatprep.mubr.bf16.mxu0 %v3316_v44 }
  0x87   :  { %1406 = vmatpush1.bf16.msra.mxu0 %v2793_v18  ;;  %v2874_v18 = vld [vmem:[#allocation5 + $0x148] ss:$16 sps:$4 sm:$0xff]  }
  0x88   :  { %1407 = vmatprep.subr.bf16.mxu0 %v2801_v22  ;;  %v105_v22 = vld [vmem:[#allocation2 + $0x58] sm:$0xff] }
  0x8b   :  { %2562 = vmatmul.mubr.msk.bf16.vlgmr.msra.gmra.mxu1 %vm1313_vm0, %v3311_v23  ;;  %1408 = vmatpush1.bf16.msra.mxu0 %v2799_v25  ;;  %v2885_v25 = vld [vmem:[#allocation5 + $0x2ec] ss:$16 sps:$4 sm:$0xff]  }
  0x8c   :  { %1490 = vmatpush1.bf16.msra.mxu1 %v2796_v24  ;;  %1409 = vmatprep.subr.bf16.mxu0 %v2807_v27  ;;  %v2882_v24 = vld [vmem:[#allocation5 + $0x12c] ss:$16 sps:$4 sm:$0xff]   ;;  %v2880_v27 = vld [vmem:[#allocation5 + $0x128] ss:$16 sps:$4 sm:$0xff]  }
  0x8d   :  { %1491 = vmatprep.subr.bf16.mxu1 %v2804_v26  ;;  %1521 = vmatprep.mubr.bf16.mxu1 %v3298_v53  ;;  %v2840_v53 = vld [vmem:[#allocation5 + $0xc] ss:$16 sps:$4 sm:$0xff]   ;;  %v3319_v26 = vpack.c.bf16 %v105_v22, %v98_v20  ;;  %v2964_v20 = vld [vmem:[#allocation5 + $0x568] ss:$16 sps:$4 sm:$0xff]  }
  0x8e   :  { %v2967_v22 = vld [vmem:[#allocation5 + $0x328] ss:$16 sps:$4 sm:$0xff]  }
  0x8f   :  { %1410 = vmatpush1.bf16.msra.mxu0 %v2805_v29  ;;  %v2888_v29 = vld [vmem:[#allocation5 + $0x10c] ss:$16 sps:$4 sm:$0xff]  }
  0x90   :  { %1492 = vmatpush1.bf16.msra.mxu1 %v2802_v28  ;;  %1411 = vmatprep.subr.bf16.mxu0 %v2813_v31  ;;  %v2883_v28 = vld [vmem:[#allocation5 + $0x2e8] ss:$16 sps:$4 sm:$0xff]  }
  0x91   :  { %1493 = vmatprep.subr.bf16.mxu1 %v2810_v30  ;;  %v2891_v30 = vld [vmem:[#allocation5 + $0x2cc] ss:$16 sps:$4 sm:$0xff]   ;;  %v2886_v31 = vld [vmem:[#allocation5 + $0x108] ss:$16 sps:$4 sm:$0xff]  }
  0x93   :  { %1412 = vmatpush1.bf16.msra.mxu0 %v2811_v33  ;;  %v2894_v33 = vld [vmem:[#allocation5 + $0x4ec] ss:$16 sps:$4 sm:$0xff]  }
  0x94   :  { %1494 = vmatpush1.bf16.msra.mxu1 %v2808_v32  ;;  %1413 = vmatprep.subr.bf16.mxu0 %v2819_v35  ;;  %v2889_v32 = vld [vmem:[#allocation5 + $0x2c8] ss:$16 sps:$4 sm:$0xff]  }
  0x95   :  { %1495 = vmatprep.subr.bf16.mxu1 %v2816_v34  ;;  %v2897_v34 = vld [vmem:[#allocation5 + $0x2ac] ss:$16 sps:$4 sm:$0xff]   ;;  %v2892_v35 = vld [vmem:[#allocation5 + $0x4e8] ss:$16 sps:$4 sm:$0xff]  }
  0x97   :  { %1414 = vmatpush1.bf16.msra.mxu0 %v2817_v37  ;;  %v2900_v37 = vld [vmem:[#allocation5 + $0x4cc] ss:$16 sps:$4 sm:$0xff]  }
  0x98   :  { %1496 = vmatpush1.bf16.msra.mxu1 %v2814_v36  ;;  %1415 = vmatprep.subr.bf16.mxu0 %v2825_v39  ;;  %v2895_v36 = vld [vmem:[#allocation5 + $0x2a8] ss:$16 sps:$4 sm:$0xff]  }
  0x99   :  { %1497 = vmatprep.subr.bf16.mxu1 %v2822_v38  ;;  %v2903_v38 = vld [vmem:[#allocation5 + $0x28c] ss:$16 sps:$4 sm:$0xff]   ;;  %v2898_v39 = vld [vmem:[#allocation5 + $0x4c8] ss:$16 sps:$4 sm:$0xff]  }
  0x9b   :  { %1416 = vmatpush1.bf16.msra.mxu0 %v2823_v43  ;;  %v2904_v43 = vld [vmem:[#allocation5 + $0x4a8] ss:$16 sps:$4 sm:$0xff]  }
  0x9c   :  { %1498 = vmatpush1.bf16.msra.mxu1 %v2820_v40  ;;  %1417 = vmatprep.subr.bf16.mxu0 %v2831_v46  ;;  %v2901_v40 = vld [vmem:[#allocation5 + $0x288] ss:$16 sps:$4 sm:$0xff]   ;;  %v2915_v46 = vld [vmem:[#allocation5 + $0x24c] ss:$16 sps:$4 sm:$0xff]  }
  0x9d   :  { %1499 = vmatprep.subr.bf16.mxu1 %v2828_v45  ;;  %v2907_v45 = vld [vmem:[#allocation5 + $0x268] ss:$16 sps:$4 sm:$0xff]  }
  0x9f   :  { %1418 = vmatpush1.bf16.msra.mxu0 %v2829_v48  ;;  %v2918_v48 = vld [vmem:[#allocation5 + $0x46c] ss:$16 sps:$4 sm:$0xff]  }
  0xa0   :  { %1500 = vmatpush1.bf16.msra.mxu1 %v2826_v47  ;;  %1419 = vmatprep.subr.bf16.mxu0 %v2837_v50  ;;  %v2910_v47 = vld [vmem:[#allocation5 + $0x488] ss:$16 sps:$4 sm:$0xff]  }
  0xa1   :  { %1501 = vmatprep.subr.bf16.mxu1 %v2834_v49  ;;  %v2921_v49 = vld [vmem:[#allocation5 + $0x22c] ss:$16 sps:$4 sm:$0xff]   ;;  %v2916_v50 = vld [vmem:[#allocation5 + $0x468] ss:$16 sps:$4 sm:$0xff]  }
  0xa3   :  { %1420 = vmatpush2.bf16.msra.mxu0 %v2835_v52  ;;  %v2924_v52 = vld [vmem:[#allocation5 + $0x44c] ss:$16 sps:$4 sm:$0xff]  }
  0xa4   :  { %1502 = vmatpush1.bf16.msra.mxu1 %v2832_v51  ;;  %1421 = vmatprep.subr.bf16.mxu0 %v2843_v55  ;;  %v2919_v51 = vld [vmem:[#allocation5 + $0x228] ss:$16 sps:$4 sm:$0xff]  }
  0xa5   :  { %1503 = vmatprep.subr.bf16.mxu1 %v2840_v53  ;;  %v2922_v53 = vld [vmem:[#allocation5 + $0x448] ss:$16 sps:$4 sm:$0xff]  }
  0xa6   :  { %v2925_v55 = vld [vmem:[#allocation5 + $0x208] ss:$16 sps:$4 sm:$0xff]  }
  0xa7   :  { %1422 = vmatpush2.bf16.msra.mxu0 %v2841_v57  ;;  %v2933_v57 = vld [vmem:[#allocation5 + $0x3ec] ss:$16 sps:$4 sm:$0xff]  }
  0xa8   :  { %1504 = vmatpush1.bf16.msra.mxu1 %v2838_v56  ;;  %1423 = vmatprep.subr.bf16.mxu0 %v2849_v59  ;;  %v2930_v56 = vld [vmem:[#allocation5 + $0x42c] ss:$16 sps:$4 sm:$0xff]   ;;  %v2931_v59 = vld [vmem:[#allocation5 + $0x3e8] ss:$16 sps:$4 sm:$0xff]  }
  0xa9   :  { %1505 = vmatprep.subr.bf16.mxu1 %v2846_v58  ;;  %v2928_v58 = vld [vmem:[#allocation5 + $0x428] ss:$16 sps:$4 sm:$0xff]  }
  0xab   :  { %1424 = vmatpush2.bf16.msra.mxu0 %v2847_v61  ;;  %v2939_v61 = vld [vmem:[#allocation5 + $0x3cc] ss:$16 sps:$4 sm:$0xff]  }
  0xac   :  { %1506 = vmatpush2.bf16.msra.mxu1 %v2844_v60  ;;  %1425 = vmatprep.subr.bf16.mxu0 %v2855_v63  ;;  %v2936_v60 = vld [vmem:[#allocation5 + $0x40c] ss:$16 sps:$4 sm:$0xff]   ;;  %v2937_v63 = vld [vmem:[#allocation5 + $0x3c8] ss:$16 sps:$4 sm:$0xff]  }
  0xad   :  { %1507 = vmatprep.subr.bf16.mxu1 %v2852_v62  ;;  %v2934_v62 = vld [vmem:[#allocation5 + $0x408] ss:$16 sps:$4 sm:$0xff]  }
  0xaf   :  { %1426 = vmatpush2.bf16.msra.mxu0 %v2853_v1  ;;  %v2945_v1 = vld [vmem:[#allocation5 + $0x3ac] ss:$16 sps:$4 sm:$0xff]  }
  0xb0   :  { %1508 = vmatpush2.bf16.msra.mxu1 %v2850_v0  ;;  %1427 = vmatprep.subr.bf16.mxu0 %v2861_v3  ;;  %v2942_v0 = vld [vmem:[#allocation5 + $0x5ec] ss:$16 sps:$4 sm:$0xff]   ;;  %v2943_v3 = vld [vmem:[#allocation5 + $0x3a8] ss:$16 sps:$4 sm:$0xff]  }
  0xb1   :  { %1509 = vmatprep.subr.bf16.mxu1 %v2858_v2  ;;  %v2940_v2 = vld [vmem:[#allocation5 + $0x5e8] ss:$16 sps:$4 sm:$0xff]  }
  0xb3   :  { %1428 = vmatpush2.bf16.msra.mxu0 %v2859_v5  ;;  %v2951_v5 = vld [vmem:[#allocation5 + $0x38c] ss:$16 sps:$4 sm:$0xff]  }
  0xb4   :  { %1510 = vmatpush2.bf16.msra.mxu1 %v2856_v4  ;;  %1429 = vmatprep.subr.bf16.mxu0 %v2867_v7  ;;  %v2948_v4 = vld [vmem:[#allocation5 + $0x5cc] ss:$16 sps:$4 sm:$0xff]   ;;  %v2949_v7 = vld [vmem:[#allocation5 + $0x388] ss:$16 sps:$4 sm:$0xff]  }
  0xb5   :  { %1511 = vmatprep.subr.bf16.mxu1 %v2864_v6  ;;  %v2946_v6 = vld [vmem:[#allocation5 + $0x5c8] ss:$16 sps:$4 sm:$0xff]  }
  0xb7   :  { %1430 = vmatpush2.bf16.msra.mxu0 %v2865_v9  ;;  %v2957_v9 = vld [vmem:[#allocation5 + $0x36c] ss:$16 sps:$4 sm:$0xff]  }
  0xb8   :  { %1512 = vmatpush2.bf16.msra.mxu1 %v2862_v8  ;;  %1431 = vmatprep.subr.bf16.mxu0 %v2873_v11  ;;  %v2954_v8 = vld [vmem:[#allocation5 + $0x5ac] ss:$16 sps:$4 sm:$0xff]   ;;  %v2955_v11 = vld [vmem:[#allocation5 + $0x368] ss:$16 sps:$4 sm:$0xff]  }
  0xb9   :  { %1513 = vmatprep.subr.bf16.mxu1 %v2870_v10  ;;  %v2952_v10 = vld [vmem:[#allocation5 + $0x5a8] ss:$16 sps:$4 sm:$0xff]  }
  0xbb   :  { %1432 = vmatpush2.bf16.msra.mxu0 %v2871_v15  ;;  %v2963_v15 = vld [vmem:[#allocation5 + $0x34c] ss:$16 sps:$4 sm:$0xff]  }
  0xbc   :  { %1514 = vmatpush2.bf16.msra.mxu1 %v2868_v14  ;;  %1433 = vmatprep.subr.bf16.mxu0 %v2879_v17  ;;  %v2960_v14 = vld [vmem:[#allocation5 + $0x58c] ss:$16 sps:$4 sm:$0xff]   ;;  %v2961_v17 = vld [vmem:[#allocation5 + $0x348] ss:$16 sps:$4 sm:$0xff]  }
  0xbd   :  { %1515 = vmatprep.subr.bf16.mxu1 %v2876_v16  ;;  %v2958_v16 = vld [vmem:[#allocation5 + $0x588] ss:$16 sps:$4 sm:$0xff]  }
  0xbf   :  { %1434 = vmatpush2.bf16.msra.mxu0 %v2877_v19  ;;  %v2969_v19 = vld [vmem:[#allocation5 + $0x32c] ss:$16 sps:$4 sm:$0xff]  }
  0xc0   :  { %1516 = vmatpush2.bf16.msra.mxu1 %v2874_v18  ;;  %1532 = vmatprep.subr.bf16.mxu0 %v2885_v25  ;;  %v2966_v18 = vld [vmem:[#allocation5 + $0x56c] ss:$16 sps:$4 sm:$0xff]  }
  0xc1   :  { %1517 = vmatprep.subr.bf16.mxu1 %v2882_v24  ;;  %v2972_v24 = vld [vmem:[#allocation5 + $0x54c] ss:$16 sps:$4 sm:$0xff]  }
  0xc2   :  { %1436 = vmatmul.mubr.bf16.vlgmr.msra.gmra.mxu0 %v3319_v26  ;;  %v2975_v25 = vld [vmem:[#allocation5 + $0x30c] ss:$16 sps:$4 sm:$0xff]  }
  0xc3   :  { %1533 = vmatpush1.bf16.msra.mxu0 %v2883_v28  ;;  %1564 = vmatprep.mubr.bf16.mxu0 %v3300_v54  ;;  %v2912_v54 = vld [vmem:[#allocation5 + $0x48c] ss:$16 sps:$4 sm:$0xff]   ;;  %v2973_v28 = vld [vmem:[#allocation5 + $0x308] ss:$16 sps:$4 sm:$0xff]  }
  0xc4   :  { %1518 = vmatpush2.bf16.msra.mxu1 %v2880_v27  ;;  %1534 = vmatprep.subr.bf16.mxu0 %v2891_v30  ;;  %v2970_v27 = vld [vmem:[#allocation5 + $0x548] ss:$16 sps:$4 sm:$0xff]  }
  0xc5   :  { %1519 = vmatprep.subr.bf16.mxu1 %v2888_v29  ;;  %v2978_v29 = vld [vmem:[#allocation5 + $0x52c] ss:$16 sps:$4 sm:$0xff]   ;;  %v2987_v30 = vld [vmem:[#allocation8 + $0x74] ss:$8 sps:$4 sm:$0xff]  }
  0xc7   :  { %1535 = vmatpush1.bf16.msra.mxu0 %v2889_v32  ;;  %v2985_v32 = vld [vmem:[#allocation8 + $0x70] ss:$8 sps:$4 sm:$0xff]  }
  0xc8   :  { %1520 = vmatpush2.bf16.msra.mxu1 %v2886_v31  ;;  %1536 = vmatprep.subr.bf16.mxu0 %v2897_v34  ;;  %v2976_v31 = vld [vmem:[#allocation5 + $0x528] ss:$16 sps:$4 sm:$0xff]  }
  0xc9   :  { %1575 = vmatprep.subr.bf16.mxu1 %v2894_v33  ;;  %v2981_v33 = vld [vmem:[#allocation5 + $0x50c] ss:$16 sps:$4 sm:$0xff]   ;;  %v2990_v34 = vld [vmem:[#allocation8 + $0x64] ss:$8 sps:$4 sm:$0xff]  }
  0xcb   :  { %1522 = vmatmul.mubr.bf16.vlgmr.msra.gmra.mxu1 %v3304_v12  ;;  %1537 = vmatpush1.bf16.msra.mxu0 %v2895_v36  ;;  %v2913_v12 = vld [vmem:[#allocation5 + $0x248] ss:$16 sps:$4 sm:$0xff]   ;;  %v2988_v36 = vld [vmem:[#allocation8 + $0x60] ss:$8 sps:$4 sm:$0xff]  }
  0xcc   :  { %1576 = vmatpush1.bf16.msra.mxu1 %v2892_v35  ;;  %1538 = vmatprep.subr.bf16.mxu0 %v2903_v38  ;;  %v2979_v35 = vld [vmem:[#allocation5 + $0x508] ss:$16 sps:$4 sm:$0xff]  }
  0xcd   :  { %1577 = vmatprep.subr.bf16.mxu1 %v2900_v37  ;;  %1607 = vmatprep.mubr.bf16.mxu1 %v3316_v44  ;;  %v2927_v44 = vld [vmem:[#allocation5 + $0x20c] ss:$16 sps:$4 sm:$0xff]   ;;  %v2993_v38 = vld [vmem:[#allocation8 + $0x54] ss:$8 sps:$4 sm:$0xff]  }
  0xce   :  { %v2984_v37 = vld [vmem:[#allocation5 + $0x60c] ss:$16 sps:$4 sm:$0xff]  }
  0xcf   :  { %1539 = vmatpush1.bf16.msra.mxu0 %v2901_v40  ;;  %v2991_v40 = vld [vmem:[#allocation8 + $0x50] ss:$8 sps:$4 sm:$0xff]  }
  0xd0   :  { %1578 = vmatpush1.bf16.msra.mxu1 %v2898_v39  ;;  %1540 = vmatprep.subr.bf16.mxu0 %v2909_v42  ;;  %v2982_v39 = vld [vmem:[#allocation5 + $0x608] ss:$16 sps:$4 sm:$0xff]  }
  0xd1   :  { %1579 = vmatprep.subr.bf16.mxu1 %v2906_v41  ;;  %v2996_v41 = vld [vmem:[#allocation8 + $0x44] ss:$8 sps:$4 sm:$0xff]   ;;  %v2999_v42 = vld [vmem:[#allocation8 + $0x34] ss:$8 sps:$4 sm:$0xff]  }
  0xd3   :  { %1541 = vmatpush1.bf16.msra.mxu0 %v2907_v45  ;;  %v3002_v45 = vld [vmem:[#allocation8 + $0x24] ss:$8 sps:$4 sm:$0xff]  }
  0xd4   :  { %1580 = vmatpush1.bf16.msra.mxu1 %v2904_v43  ;;  %1542 = vmatprep.subr.bf16.mxu0 %v2915_v46  ;;  %v2997_v43 = vld [vmem:[#allocation8 + $0x30] ss:$8 sps:$4 sm:$0xff]   ;;  %v3035_v46 = vld [vmem:[#allocation8 + $0x174] ss:$8 sps:$4 sm:$0xff]  }
  0xd5   :  { %1581 = vmatprep.subr.bf16.mxu1 %v2912_v54  ;;  %v3033_v54 = vld [vmem:[#allocation8 + $0x170] ss:$8 sps:$4 sm:$0xff]  }
  0xd7   :  { %1543 = vmatpush1.bf16.msra.mxu0 %v2913_v12  ;;  %v3000_v12 = vld [vmem:[#allocation8 + $0x20] ss:$8 sps:$4 sm:$0xff]  }
  0xd8   :  { %1582 = vmatpush1.bf16.msra.mxu1 %v2910_v47  ;;  %1544 = vmatprep.subr.bf16.mxu0 %v2921_v49  ;;  %v3038_v47 = vld [vmem:[#allocation8 + $0x164] ss:$8 sps:$4 sm:$0xff]   ;;  %v3003_v49 = vld [vmem:[#allocation8 + $0x10] ss:$8 sps:$4 sm:$0xff]  }
  0xd9   :  { %1583 = vmatprep.subr.bf16.mxu1 %v2918_v48  ;;  %v3041_v48 = vld [vmem:[#allocation8 + $0x154] ss:$8 sps:$4 sm:$0xff]  }
  0xdb   :  { %1545 = vmatpush1.bf16.msra.mxu0 %v2919_v51  ;;  %v3039_v51 = vld [vmem:[#allocation8 + $0x150] ss:$8 sps:$4 sm:$0xff]  }
  0xdc   :  { %1584 = vmatpush1.bf16.msra.mxu1 %v2916_v50  ;;  %1546 = vmatprep.subr.bf16.mxu0 %v2927_v44  ;;  %v3008_v50 = vld [vmem:[#allocation8 + $0x4] ss:$8 sps:$4 sm:$0xff]   ;;  %v3011_v44 = vld [vmem:[#allocation8 + $0xf4] ss:$8 sps:$4 sm:$0xff]  }
  0xdd   :  { %1585 = vmatprep.subr.bf16.mxu1 %v2924_v52  ;;  %v3006_v52 = vld [vmem:[#allocation8] ss:$8 sps:$4 sm:$0xff]  }
  0xdf   :  { %1547 = vmatpush1.bf16.msra.mxu0 %v2925_v55  ;;  %v3047_v55 = vld [vmem:[#allocation8 + $0x134] ss:$8 sps:$4 sm:$0xff]  }
  0xe0   :  { %1586 = vmatpush1.bf16.msra.mxu1 %v2922_v53  ;;  %1548 = vmatprep.subr.bf16.mxu0 %v2933_v57  ;;  %v3042_v53 = vld [vmem:[#allocation8 + $0x140] ss:$8 sps:$4 sm:$0xff]   ;;  %v3014_v57 = vld [vmem:[#allocation8 + $0xe4] ss:$8 sps:$4 sm:$0xff]  }
  0xe1   :  { %1587 = vmatprep.subr.bf16.mxu1 %v2930_v56  ;;  %v3009_v56 = vld [vmem:[#allocation8 + $0xf0] ss:$8 sps:$4 sm:$0xff]  }
  0xe3   :  { %1549 = vmatpush2.bf16.msra.mxu0 %v2931_v59  ;;  %v3050_v59 = vld [vmem:[#allocation8 + $0x124] ss:$8 sps:$4 sm:$0xff]  }
  0xe4   :  { %1588 = vmatpush1.bf16.msra.mxu1 %v2928_v58  ;;  %1550 = vmatprep.subr.bf16.mxu0 %v2939_v61  ;;  %v3045_v58 = vld [vmem:[#allocation8 + $0x130] ss:$8 sps:$4 sm:$0xff]   ;;  %v3017_v61 = vld [vmem:[#allocation8 + $0xd4] ss:$8 sps:$4 sm:$0xff]  }
  0xe5   :  { %1589 = vmatprep.subr.bf16.mxu1 %v2936_v60  ;;  %v3012_v60 = vld [vmem:[#allocation8 + $0xe0] ss:$8 sps:$4 sm:$0xff]  }
  0xe7   :  { %1551 = vmatpush2.bf16.msra.mxu0 %v2937_v63  ;;  %v3053_v63 = vld [vmem:[#allocation8 + $0x114] ss:$8 sps:$4 sm:$0xff]  }
  0xe8   :  { %1590 = vmatpush1.bf16.msra.mxu1 %v2934_v62  ;;  %1552 = vmatprep.subr.bf16.mxu0 %v2945_v1  ;;  %v3048_v62 = vld [vmem:[#allocation8 + $0x120] ss:$8 sps:$4 sm:$0xff]   ;;  %v3020_v1 = vld [vmem:[#allocation8 + $0xc4] ss:$8 sps:$4 sm:$0xff]  }
  0xe9   :  { %1591 = vmatprep.subr.bf16.mxu1 %v2942_v0  ;;  %v3015_v0 = vld [vmem:[#allocation8 + $0xd0] ss:$8 sps:$4 sm:$0xff]  }
  0xeb   :  { %1553 = vmatpush2.bf16.msra.mxu0 %v2943_v3  ;;  %v3056_v3 = vld [vmem:[#allocation8 + $0x104] ss:$8 sps:$4 sm:$0xff]  }
  0xec   :  { %1592 = vmatpush2.bf16.msra.mxu1 %v2940_v2  ;;  %1554 = vmatprep.subr.bf16.mxu0 %v2951_v5  ;;  %v3051_v2 = vld [vmem:[#allocation8 + $0x110] ss:$8 sps:$4 sm:$0xff]   ;;  %v3023_v5 = vld [vmem:[#allocation8 + $0xb4] ss:$8 sps:$4 sm:$0xff]  }
  0xed   :  { %1593 = vmatprep.subr.bf16.mxu1 %v2948_v4  ;;  %v3018_v4 = vld [vmem:[#allocation8 + $0xc0] ss:$8 sps:$4 sm:$0xff]  }
  0xef   :  { %1555 = vmatpush2.bf16.msra.mxu0 %v2949_v7  ;;  %v3059_v7 = vld [vmem:[#allocation8 + $0x1f4] ss:$8 sps:$4 sm:$0xff]  }
  0xf0   :  { %1594 = vmatpush2.bf16.msra.mxu1 %v2946_v6  ;;  %1556 = vmatprep.subr.bf16.mxu0 %v2957_v9  ;;  %v3054_v6 = vld [vmem:[#allocation8 + $0x100] ss:$8 sps:$4 sm:$0xff]   ;;  %v3026_v9 = vld [vmem:[#allocation8 + $0xa4] ss:$8 sps:$4 sm:$0xff]  }
  0xf1   :  { %1595 = vmatprep.subr.bf16.mxu1 %v2954_v8  ;;  %v3021_v8 = vld [vmem:[#allocation8 + $0xb0] ss:$8 sps:$4 sm:$0xff]  }
  0xf3   :  { %1557 = vmatpush2.bf16.msra.mxu0 %v2955_v11  ;;  %v3024_v11 = vld [vmem:[#allocation8 + $0xa0] ss:$8 sps:$4 sm:$0xff]  }
  0xf4   :  { %1596 = vmatpush2.bf16.msra.mxu1 %v2952_v10  ;;  %1558 = vmatprep.subr.bf16.mxu0 %v2963_v15  ;;  %v3057_v10 = vld [vmem:[#allocation8 + $0x1f0] ss:$8 sps:$4 sm:$0xff]  }
  0xf5   :  { %1597 = vmatprep.subr.bf16.mxu1 %v2960_v14  ;;  %v3029_v14 = vld [vmem:[#allocation8 + $0x94] ss:$8 sps:$4 sm:$0xff]   ;;  %v3027_v15 = vld [vmem:[#allocation8 + $0x90] ss:$8 sps:$4 sm:$0xff]  }
  0xf7   :  { %1559 = vmatpush2.bf16.msra.mxu0 %v2961_v17  ;;  %v3030_v17 = vld [vmem:[#allocation8 + $0x80] ss:$8 sps:$4 sm:$0xff]  }
  0xf8   :  { %1598 = vmatpush2.bf16.msra.mxu1 %v2958_v16  ;;  %1560 = vmatprep.subr.bf16.mxu0 %v2969_v19  ;;  %v3032_v16 = vld [vmem:[#allocation8 + $0x84] ss:$8 sps:$4 sm:$0xff]   ;;  %v3060_v19 = vld [vmem:[#allocation8 + $0x1e0] ss:$8 sps:$4 sm:$0xff]  }
  0xf9   :  { %1599 = vmatprep.subr.bf16.mxu1 %v2966_v18  ;;  %v3062_v18 = vld [vmem:[#allocation8 + $0x1e4] ss:$8 sps:$4 sm:$0xff]  }
  0xfb   :  { %1561 = vmatpush2.bf16.msra.mxu0 %v2967_v22  ;;  %v3063_v22 = vld [vmem:[#allocation8 + $0x1d0] ss:$8 sps:$4 sm:$0xff]  }
  0xfc   :  { %1600 = vmatpush2.bf16.msra.mxu1 %v2964_v20  ;;  %1562 = vmatprep.subr.bf16.mxu0 %v2975_v25  ;;  %v3065_v20 = vld [vmem:[#allocation8 + $0x1d4] ss:$8 sps:$4 sm:$0xff]   ;;  %v3066_v25 = vld [vmem:[#allocation8 + $0x1c0] ss:$8 sps:$4 sm:$0xff]  }
  0xfd   :  { %1601 = vmatprep.subr.bf16.mxu1 %v2972_v24  ;;  %v3068_v24 = vld [vmem:[#allocation8 + $0x1c4] ss:$8 sps:$4 sm:$0xff]  }
  0xff   :  { %1563 = vmatpush2.bf16.msra.mxu0 %v2973_v28  ;;  %v3069_v28 = vld [vmem:[#allocation8 + $0x1b0] ss:$8 sps:$4 sm:$0xff]  }
 0x100   :  { %1602 = vmatpush2.bf16.msra.mxu1 %v2970_v27  ;;  %2069 = vmatprep.subr.bf16.mxu0 %v2987_v30  ;;  %v3071_v27 = vld [vmem:[#allocation8 + $0x1b4] ss:$8 sps:$4 sm:$0xff]   ;;  %v3072_v30 = vld [vmem:[#allocation8 + $0x1a0] ss:$8 sps:$4 sm:$0xff]  }
 0x101   :  { %1603 = vmatprep.subr.bf16.mxu1 %v2978_v29  ;;  %v3074_v29 = vld [vmem:[#allocation8 + $0x1a4] ss:$8 sps:$4 sm:$0xff]  }
 0x102   :  { %1565 = vmatmul.mubr.bf16.vlgmr.msra.gmra.mxu0 %v3306_v13  ;;  %v2994_v13 = vld [vmem:[#allocation8 + $0x40] ss:$8 sps:$4 sm:$0xff]  }
 0x103   :  { %2070 = vmatpush1.bf16.msra.mxu0 %v2985_v32  ;;  %v3075_v32 = vld [vmem:[#allocation8 + $0x190] ss:$8 sps:$4 sm:$0xff]  }
 0x104   :  { %1604 = vmatpush2.bf16.msra.mxu1 %v2976_v31  ;;  %2071 = vmatprep.subr.bf16.mxu0 %v2990_v34  ;;  %v3077_v31 = vld [vmem:[#allocation8 + $0x194] ss:$8 sps:$4 sm:$0xff]   ;;  %v3078_v34 = vld [vmem:[#allocation8 + $0x180] ss:$8 sps:$4 sm:$0xff]  }
 0x105   :  { %1605 = vmatprep.subr.bf16.mxu1 %v2981_v33  ;;  %v3080_v33 = vld [vmem:[#allocation8 + $0x184] ss:$8 sps:$4 sm:$0xff]  }
 0x107   :  { %2072 = vmatpush1.bf16.msra.mxu0 %v2988_v36  ;;  %v313_v36 = vlaneseq }
 0x108   :  { %1606 = vmatpush2.bf16.msra.mxu1 %v2979_v35  ;;  %2073 = vmatprep.subr.bf16.mxu0 %v2993_v38 }
 0x109   :  { %1632 = vmatprep.subr.bf16.mxu1 %v2984_v37  ;;  %v3330_v38 = vshrl.u32 %v313_v36, 7 }
 0x10b   :  { %1608 = vmatmul.mubr.bf16.vlgmr.msra.gmra.mxu1 %v3319_v26  ;;  %2074 = vmatpush1.bf16.msra.mxu0 %v2991_v40  ;;  %v3005_v26 = vld [vmem:[#allocation8 + $0x14] ss:$8 sps:$4 sm:$0xff]  }
 0x10c   :  { %1633 = vmatpush1.bf16.msra.mxu1 %v2982_v39  ;;  %1650 = vmatprep.mubr.bf16.mxu1 %v3238_v21  ;;  %v3036_v21 = vld [vmem:[#allocation8 + $0x160] ss:$8 sps:$4 sm:$0xff]  }
 0x10d   :  { %2075 = vmatprep.subr.bf16.mxu0 %v2996_v41  ;;  %2112 = vmatprep.subr.bf16.mxu1 %v3035_v46  ;;  %v319_v41 = vsub.s32 1, %v3330_v38 }
 0x10f   :  { %2076 = vmatpush1.bf16.msra.mxu0 %v2994_v13  ;;  %v315_v13 = vsub.s32 0, %v3330_v38 }
 0x110   :  { %2077 = vmatprep.subr.bf16.mxu0 %v2999_v42 }
 0x113   :  { %2563 = vmatmul.mubr.msk.bf16.vlgmr.msra.gmra.mxu1 %vm1313_vm0, %v3311_v23  ;;  %2078 = vmatpush1.bf16.msra.mxu0 %v2997_v43  ;;  %v3044_v23 = vld [vmem:[#allocation8 + $0x144] ss:$8 sps:$4 sm:$0xff]   ;;  %v311_v43 = vld [vmem:[#allocation7] sm:$0xf] }
 0x114   :  { %2079 = vmatprep.subr.bf16.mxu0 %v3002_v45  ;;  %2113 = vmatpush1.bf16.msra.mxu1 %v3033_v54  ;;  %v320_v54 = vrot.slane %v311_v43, %v319_v41  ;;  %v316_v46 = vrot.slane %v311_v43, %v315_v13 }
 0x115   :  { %2114 = vmatprep.subr.bf16.mxu1 %v3038_v47 }
 0x117   :  { %2080 = vmatpush1.bf16.msra.mxu0 %v3000_v12 }
 0x118   :  { %2081 = vmatprep.subr.bf16.mxu0 %v3005_v26  ;;  %2115 = vmatpush1.bf16.msra.mxu1 %v3036_v21 }
 0x119   :  { %2116 = vmatprep.subr.bf16.mxu1 %v3041_v48 }
 0x11b   :  { %2082 = vmatpush1.bf16.msra.mxu0 %v3003_v49 }
 0x11c   :  { %2083 = vmatprep.subr.bf16.mxu0 %v3008_v50  ;;  %2117 = vmatpush1.bf16.msra.mxu1 %v3039_v51 }
 0x11d   :  { %2118 = vmatprep.subr.bf16.mxu1 %v3044_v23 }
 0x11f   :  { %2084 = vmatpush1.bf16.msra.mxu0 %v3006_v52 }
 0x120   :  { %2085 = vmatprep.subr.bf16.mxu0 %v3011_v44  ;;  %2119 = vmatpush1.bf16.msra.mxu1 %v3042_v53 }
 0x121   :  { %2120 = vmatprep.subr.bf16.mxu1 %v3047_v55 }
 0x123   :  { %2086 = vmatpush2.bf16.msra.mxu0 %v3009_v56 }
 0x124   :  { %2087 = vmatprep.subr.bf16.mxu0 %v3014_v57  ;;  %2121 = vmatpush1.bf16.msra.mxu1 %v3045_v58 }
 0x125   :  { %2122 = vmatprep.subr.bf16.mxu1 %v3050_v59 }
 0x127   :  { %2088 = vmatpush2.bf16.msra.mxu0 %v3012_v60 }
 0x128   :  { %2089 = vmatprep.subr.bf16.mxu0 %v3017_v61  ;;  %2123 = vmatpush1.bf16.msra.mxu1 %v3048_v62 }
 0x129   :  { %2124 = vmatprep.subr.bf16.mxu1 %v3053_v63 }
 0x12b   :  { %2090 = vmatpush2.bf16.msra.mxu0 %v3015_v0 }
 0x12c   :  { %2091 = vmatprep.subr.bf16.mxu0 %v3020_v1  ;;  %2125 = vmatpush1.bf16.msra.mxu1 %v3051_v2 }
 0x12d   :  { %2126 = vmatprep.subr.bf16.mxu1 %v3056_v3 }
 0x12f   :  { %2092 = vmatpush2.bf16.msra.mxu0 %v3018_v4 }
 0x130   :  { %2093 = vmatprep.subr.bf16.mxu0 %v3023_v5  ;;  %2127 = vmatpush1.bf16.msra.mxu1 %v3054_v6 }
 0x131   :  { %2128 = vmatprep.subr.bf16.mxu1 %v3059_v7 }
 0x133   :  { %2094 = vmatpush2.bf16.msra.mxu0 %v3021_v8 }
 0x134   :  { %2095 = vmatprep.subr.bf16.mxu0 %v3026_v9  ;;  %2129 = vmatpush2.bf16.msra.mxu1 %v3057_v10 }
 0x135   :  { %2130 = vmatprep.subr.bf16.mxu1 %v3062_v18  ;;  %v327_v18 = vsub.s32 3, %v3330_v38 }
 0x137   :  { %2096 = vmatpush2.bf16.msra.mxu0 %v3024_v11 }
 0x138   :  { %2097 = vmatprep.subr.bf16.mxu0 %v3029_v14  ;;  %2131 = vmatpush2.bf16.msra.mxu1 %v3060_v19  ;;  %v323_v19 = vsub.s32 2, %v3330_v38 }
 0x139   :  { %2132 = vmatprep.subr.bf16.mxu1 %v3065_v20 }
 0x13b   :  { %2098 = vmatpush2.bf16.msra.mxu0 %v3027_v15 }
 0x13c   :  { %2099 = vmatprep.subr.bf16.mxu0 %v3032_v16  ;;  %2133 = vmatpush2.bf16.msra.mxu1 %v3063_v22 }
 0x13d   :  { %2134 = vmatprep.subr.bf16.mxu1 %v3068_v24 }
 0x13f   :  { %2100 = vmatpush2.bf16.msra.mxu0 %v3030_v17 }
 0x140   :  { %2135 = vmatpush2.bf16.msra.mxu1 %v3066_v25  ;;  %v328_v25 = vrot.slane %v311_v43, %v327_v18 }
 0x141   :  { %2136 = vmatprep.subr.bf16.mxu1 %v3071_v27  ;;  %v324_v27 = vrot.slane %v311_v43, %v323_v19 }
 0x142   :  { %v1351_v39 = vpop.f32.mrf.mxu0 }
 0x143   :  { %v1394_v35 = vpop.f32.mrf.mxu1  ;;  %v1352_v21 = vadd.f32 %v1351_v39, %v316_v46 }
 0x144   :  { %2137 = vmatpush2.bf16.msra.mxu1 %v3069_v28  ;;  %v1353_v42 = vpop.f32.mrf.mxu0 }
 0x145   :  { %2138 = vmatprep.subr.bf16.mxu1 %v3074_v29  ;;  %v1396_v37 = vpop.f32.mrf.mxu1  ;;  %v1354_v26 = vadd.f32 %v1353_v42, %v320_v54  ;;  %v1395_v44 = vadd.f32 %v1394_v35, %v1352_v21 }
 0x146   :  { %v1355_v47 = vpop.f32.mrf.mxu0 }
 0x147   :  { %v1398_v40 = vpop.f32.mrf.mxu1  ;;  %v1356_v49 = vadd.f32 %v1355_v47, %v316_v46  ;;  %v1397_v23 = vadd.f32 %v1396_v37, %v1354_v26 }
 0x148   :  { %2139 = vmatpush2.bf16.msra.mxu1 %v3072_v30  ;;  %v1357_v48 = vpop.f32.mrf.mxu0 }
 0x149   :  { %2140 = vmatprep.subr.bf16.mxu1 %v3077_v31  ;;  %v1400_v45 = vpop.f32.mrf.mxu1  ;;  %v1358_v52 = vadd.f32 %v1357_v48, %v320_v54  ;;  %v1399_v55 = vadd.f32 %v1398_v40, %v1356_v49 }
 0x14b   :  { %v1480_v12 = vpop.f32.mrf.mxu1  ;;  %v1401_v60 = vadd.f32 %v1400_v45, %v1358_v52  ;;  %v3083_v52 = vld [vmem:[#allocation10 + $0x70] sm:$0xff]  }
 0x14c   :  { %2141 = vmatpush2.bf16.msra.mxu1 %v3075_v32 }
 0x14d   :  { %2142 = vmatprep.subr.bf16.mxu1 %v3080_v33  ;;  %v1482_v50 = vpop.f32.mrf.mxu1 }
 0x14f   :  { %v1484_v57 = vpop.f32.mrf.mxu1 }
 0x150   :  { %2143 = vmatpush2.bf16.msra.mxu1 %v3078_v34 }
 0x151   :  { %v1486_v2 = vpop.f32.mrf.mxu1 }
 0x182   :  { %v1437_v51 = vpop.f32.mrf.mxu0 }
 0x183   :  { %v1438_v58 = vadd.f32 %v1437_v51, %v1395_v44  ;;  %v3081_v51 = vld [vmem:[#allocation10 + $0x78] sm:$0xff]  }
 0x184   :  { %v1439_v53 = vpop.f32.mrf.mxu0  ;;  %2654 = vmatprep.subr.bf16.mxu0 %v3081_v51 }
 0x185   :  { %v1440_v56 = vadd.f32 %v1439_v53, %v1397_v23  ;;  %v1481_v3 = vadd.f32 %v1480_v12, %v1438_v58  ;;  %v3082_v23 = vld [vmem:[#allocation10 + $0x38] sm:$0xff]  }
 0x186   :  { %v1441_v59 = vpop.f32.mrf.mxu0 }
 0x187   :  { %v1442_v61 = vadd.f32 %v1441_v59, %v1399_v55  ;;  %v1483_v63 = vadd.f32 %v1482_v50, %v1440_v56  ;;  %v1661_v8 = vmax.f32 %v1481_v3, 0.0  ;;  %v3085_v59 = vld [vmem:[#allocation10 + $0x68] sm:$0xff]   ;;  %v3092_v3 = vld [vmem:[#allocation10 + $0x10] sm:$0xff]  }
 0x188   :  { %v1443_v62 = vpop.f32.mrf.mxu0 }
 0x189   :  { %v1485_v0 = vadd.f32 %v1484_v57, %v1442_v61  ;;  %v1444_v1 = vadd.f32 %v1443_v62, %v1401_v60  ;;  %v1662_v6 = vmax.f32 %v1483_v63, 0.0  ;;  %v3084_v57 = vld [vmem:[#allocation10 + $0x30] sm:$0xff]   ;;  %v3086_v61 = vld [vmem:[#allocation10 + $0x28] sm:$0xff]   ;;  %v3087_v62 = vld [vmem:[#allocation10 + $0x60] sm:$0xff]  }
 0x18a   :  { %v3088_v63 = vld [vmem:[#allocation10 + $0x20] sm:$0xff]  }
 0x18b   :  { %v1487_v4 = vadd.f32 %v1486_v2, %v1444_v1  ;;  %v1665_v5 = vmax.f32 %v1485_v0, 0.0  ;;  %v1523_v11 = vpop.f32.mrf.mxu1  ;;  %v3089_v0 = vld [vmem:[#allocation10 + $0x58] sm:$0xff]   ;;  %v3091_v2 = vld [vmem:[#allocation10 + $0x50] sm:$0xff]  }
 0x18c   :  { %v1524_v33 = vadd.f32 %v1523_v11, %v324_v27  ;;  %v3090_v1 = vld [vmem:[#allocation10 + $0x18] sm:$0xff]  }
 0x18d   :  { %v1666_v7 = vmax.f32 %v1487_v4, 0.0  ;;  %v1669_v10 = vpack.c.bf16 %v1665_v5, %v1661_v8  ;;  %v1525_v14 = vpop.f32.mrf.mxu1  ;;  %v3093_v4 = vld [vmem:[#allocation10 + $0x48] sm:$0xff]  }
 0x18e   :  { %v1526_v31 = vadd.f32 %v1525_v14, %v328_v25  ;;  %v3094_v5 = vld [vmem:[#allocation10 + $0x8] sm:$0xff]  }
 0x18f   :  { %v1670_v9 = vpack.c.bf16 %v1666_v7, %v1662_v6  ;;  %v1527_v15 = vpop.f32.mrf.mxu1  ;;  %v3095_v6 = vld [vmem:[#allocation10 + $0x40] sm:$0xff]  }
 0x190   :  { %v1528_v32 = vadd.f32 %v1527_v15, %v324_v27  ;;  %v3096_v7 = vld [vmem:[#allocation10] sm:$0xff]  }
 0x191   :  { %2101 = vmatprep.mubr.bf16.mxu0 %v1670_v9  ;;  %v1529_v17 = vpop.f32.mrf.mxu1 }
 0x192   :  { %2102 = vmatmul.mubr.bf16.vlgmr.msra.gmra.mxu0 %v1669_v10  ;;  %v1530_v36 = vadd.f32 %v1529_v17, %v328_v25  ;;  %v1737_v10 = vld [vmem:[%s3360_s4] sm:$0x3] }
 0x193   :  { %2655 = vmatpush3.bf16.msra.mxu0 %v3082_v23  ;;  %v1746_v14 = vrot.slane %v1737_v10, %v319_v41  ;;  %v1742_v15 = vrot.slane %v1737_v10, %v315_v13 }
 0x194   :  { %2656 = vmatprep.subr.bf16.mxu0 %v3083_v52 }
 0x197   :  { %2657 = vmatpush3.bf16.msra.mxu0 %v3084_v57 }
 0x198   :  { %2658 = vmatprep.subr.bf16.mxu0 %v3085_v59 }
 0x19b   :  { %2659 = vmatpush3.bf16.msra.mxu0 %v3086_v61 }
 0x19c   :  { %2660 = vmatprep.subr.bf16.mxu0 %v3087_v62 }
 0x19f   :  { %2661 = vmatpush3.bf16.msra.mxu0 %v3088_v63 }
 0x1a0   :  { %2662 = vmatprep.subr.bf16.mxu0 %v3089_v0 }
 0x1a3   :  { %2663 = vmatpush3.bf16.msra.mxu0 %v3090_v1 }
 0x1a4   :  { %2664 = vmatprep.subr.bf16.mxu0 %v3091_v2 }
 0x1a7   :  { %2665 = vmatpush3.bf16.msra.mxu0 %v3092_v3 }
 0x1a8   :  { %2666 = vmatprep.subr.bf16.mxu0 %v3093_v4 }
 0x1ab   :  { %2667 = vmatpush3.bf16.msra.mxu0 %v3094_v5 }
 0x1ac   :  { %2668 = vmatprep.subr.bf16.mxu0 %v3095_v6 }
 0x1af   :  { %2669 = vmatpush3.bf16.msra.mxu0 %v3096_v7 }
 0x1c2   :  { %v1566_v16 = vpop.f32.mrf.mxu0 }
 0x1c3   :  { %v1567_v40 = vadd.f32 %v1566_v16, %v1524_v33 }
 0x1c4   :  { %v1568_v20 = vpop.f32.mrf.mxu0 }
 0x1c5   :  { %v1569_v37 = vadd.f32 %v1568_v20, %v1526_v31 }
 0x1c6   :  { %v1570_v28 = vpop.f32.mrf.mxu0 }
 0x1c7   :  { %v1571_v39 = vadd.f32 %v1570_v28, %v1528_v32 }
 0x1c8   :  { %v1572_v34 = vpop.f32.mrf.mxu0 }
 0x1c9   :  { %v1573_v45 = vadd.f32 %v1572_v34, %v1530_v36 }
 0x1cb   :  { %v1609_v22 = vpop.f32.mrf.mxu1 }
 0x1cc   :  { %v1610_v47 = vadd.f32 %v1609_v22, %v1567_v40  ;;  %v2628_v40 = vld [vmem:[%s3362_s6] ss:$0 sm:$0xff] }
 0x1cd   :  { %v1611_v24 = vpop.f32.mrf.mxu1 }
 0x1ce   :  { %v1612_v54 = vadd.f32 %v1611_v24, %v1569_v37 }
 0x1cf   :  { %v1613_v29 = vpop.f32.mrf.mxu1 }
 0x1d0   :  { %v1614_v46 = vadd.f32 %v1613_v29, %v1571_v39 }
 0x1d1   :  { %v1615_v30 = vpop.f32.mrf.mxu1 }
 0x1d2   :  { %v1616_v26 = vadd.f32 %v1615_v30, %v1573_v45 }
 0x1d3   :  { %v1652_v35 = vpop.f32.mrf.mxu1 }
 0x1d4   :  { %v1653_v48 = vadd.f32 %v1652_v35, %v1610_v47 }
 0x1d5   :  { %v1654_v42 = vpop.f32.mrf.mxu1 }
 0x1d6   :  { %v1655_v43 = vadd.f32 %v1654_v42, %v1612_v54  ;;  %v1663_v56 = vmax.f32 %v1653_v48, 0.0 }
 0x1d7   :  { %v1656_v12 = vpop.f32.mrf.mxu1 }
 0x1d8   :  { %v1657_v21 = vadd.f32 %v1656_v12, %v1614_v46  ;;  %v1664_v53 = vmax.f32 %v1655_v43, 0.0 }
 0x1d9   :  { %v1658_v49 = vpop.f32.mrf.mxu1 }
 0x1da   :  { %v1659_v50 = vadd.f32 %v1658_v49, %v1616_v26  ;;  %v1667_v44 = vmax.f32 %v1657_v21, 0.0 }
 0x1dc   :  { %v1668_v55 = vmax.f32 %v1659_v50, 0.0  ;;  %v1671_v60 = vpack.c.bf16 %v1667_v44, %v1663_v56 }
 0x1de   :  { %v1672_v58 = vpack.c.bf16 %v1668_v55, %v1664_v53 }
 0x1e0   :  { %2144 = vmatprep.mubr.bf16.mxu1 %v1672_v58 }
 0x1e1   :  { %2145 = vmatmul.mubr.bf16.vlgmr.msra.gmra.mxu1 %v1671_v60 }
 0x252   :  { %v2103_v8 = vpop.f32.mrf.mxu0 }
 0x253   :  { %v2104_v22 = vadd.f32 %v2103_v8, %v1742_v15 }
 0x254   :  { %v2105_v9 = vpop.f32.mrf.mxu0 }
 0x255   :  { %v2106_v19 = vadd.f32 %v2105_v9, %v1746_v14 }
 0x256   :  { %v2107_v11 = vpop.f32.mrf.mxu0 }
 0x257   :  { %v2108_v20 = vadd.f32 %v2107_v11, %v1742_v15 }
 0x258   :  { %v2109_v17 = vpop.f32.mrf.mxu0 }
 0x259   :  { %v2110_v25 = vadd.f32 %v2109_v17, %v1746_v14 }
 0x2a1   :  { %v2146_v16 = vpop.f32.mrf.mxu1 }
 0x2a2   :  { %v2147_v29 = vadd.f32 %v2146_v16, %v2104_v22 }
 0x2a3   :  { %v2148_v18 = vpop.f32.mrf.mxu1 }
 0x2a4   :  { %v2149_v27 = vadd.f32 %v2148_v18, %v2106_v19  ;;  %v2155_v41 = vmax.f32 %v2147_v29, 0.0 }
 0x2a5   :  { %v2150_v24 = vpop.f32.mrf.mxu1 }
 0x2a6   :  { %v2151_v28 = vadd.f32 %v2150_v24, %v2108_v20  ;;  %v2156_v33 = vmax.f32 %v2149_v27, 0.0 }
 0x2a7   :  { %v2152_v30 = vpop.f32.mrf.mxu1 }
 0x2a8   :  { %v2153_v31 = vadd.f32 %v2152_v30, %v2110_v25  ;;  %v2157_v32 = vmax.f32 %v2151_v28, 0.0 }
 0x2aa   :  { %v2158_v34 = vmax.f32 %v2153_v31, 0.0  ;;  %v2159_v38 = vpack.c.bf16 %v2157_v32, %v2155_v41 }
 0x2ac   :  { %v2160_v35 = vpack.c.bf16 %v2158_v34, %v2156_v33 }
 0x2ae   :  { %2328 = vmatprep.mubr.bf16.mxu0 %v2160_v35 }
 0x2af   :  { %2329 = vmatmul.mubr.bf16.vlgmr.msra.gmra.mxu0 %v2159_v38 }
 0x36f   :  { %v2670_v13 = vpop.f32.mrf.mxu0 }
 0x371   :  { %v2671_v36 = vpop.f32.mrf.mxu0 }
 0x372   :  { %v2672_v39 = vadd.f32 %v2671_v36, %v2670_v13 }
 0x373   :  { %v2673_v37 = vpop.f32.mrf.mxu0 }
 0x374   :  { %v2331_v54 = vadd.f32 %v2672_v39, %v2628_v40 }
 0x375   :  { %v2674_v42 = vpop.f32.mrf.mxu0 }
 0x376   :  { %v2675_v45 = vadd.f32 %v2674_v42, %v2673_v37 }
 0x378   :  { %v2334_v46 = vadd.f32 %v2675_v45, %v2628_v40 }
 0x37a   :  { %v2652_v47 = vpack.c.bf16 %v2334_v46, %v2331_v54 }
 0x37c   :  { %2653 = vst [vmem:[#allocation11] sm:$0xff] %v2652_v47  }
 0x37d   :  { %3208 = shalt.err (!%p3205_p1)
}
 0x37e   :  { %2358 = dma.vmem_to_hbm [thread:$0]  %s2353_s10, 128, %s3363_s7, [#allocation4], %s3236_s0, %s3236_s0, %s3237_s28  }
 0x37f   :  { %3223 = dma.done.wait [#allocation4], 128  }
 0x380   :  { %3224 = vsyncadd [#allocation4], 4294967168 }
 0x381   :  { %2362 = vsyncpa [#allocation3], 1 }
 0x382   :  { %2363 = vsyncpa [#allocation6], 1 }
 0x383   :  { %2364 = vsyncpa [#allocation9], 1 }
 0x384   :  { %2365 = vsyncpa [#allocation4], 1 }

</bundles_post_ra>
